<compile_context>
chip_gen: v7x
topology: tpu7x:2x2x1
jax: 0.10.0
libtpu: 0.0.40
codegen_flags: <defaults>
</compile_context>

<pallas_src>
import functools
import math

import jax
import jax.numpy as jnp
from jax.experimental import pallas as pl
from jax.experimental.pallas import tpu as pltpu


def _pos_enc_kernel(yx_ref, cst_ref, w_ref, o_ref, *, hd2, d, mxu_dtype):
    # yx_ref : (1, 2, TILE)  row 0 = scaled y_embed, row 1 = scaled x_embed
    # cst_ref: (C, 4)        packed constants:
    #                          [:hd2, 0] = 1/dim_t on the y-feature channels
    #                          [:hd2, 1] = 1/dim_t on the x-feature channels
    #                          [:hd2, 2] = phase (0 even, pi/2 odd -> cos)
    #                          [:d,   3] = conv bias
    # w_ref  : (D, 2HD)      1x1-conv weight (channel-major)
    # o_ref  : (1, D, TILE)  output block, already NCHW-flat
    y = yx_ref[0, 0:1, :]                       # (1, TILE)
    x = yx_ref[0, 1:2, :]                       # (1, TILE)
    ay = cst_ref[0:hd2, 0:1]                    # (2HD, 1)
    ax = cst_ref[0:hd2, 1:2]                    # (2HD, 1)
    ph = cst_ref[0:hd2, 2:3]                    # (2HD, 1)
    bias = cst_ref[0:d, 3:4]                    # (D, 1)

    # Fourier features, channel-major.  Even channel -> sin(pos), odd channel
    # -> cos(pos) == sin(pos + pi/2): one EUP transcendental per element.
    feat = jnp.sin(ay * y + ax * x + ph)        # (2HD, TILE)

    w = w_ref[...]
    if mxu_dtype is not None:                   # opt-in (e.g. bf16 on v7x)
        feat = feat.astype(mxu_dtype)
        w = w.astype(mxu_dtype)

    out = jnp.dot(w, feat, preferred_element_type=jnp.float32)   # (D, TILE)
    o_ref[0] = (out + bias).astype(o_ref.dtype)


def _pick_tile(hw_padded, b):
    """Tile along the flattened (128-aligned) spatial axis of one batch element.

    Prefer the largest tile (<= 4096) that still leaves >= 8 total grid steps
    (>= 4 per TensorCore on v7x) so the output-writeback pipeline stays full;
    fall back to 128 (max step count) for tiny problems.
    """
    cands = [t for t in range(128, min(hw_padded, 4096) + 1, 128)
             if hw_padded % t == 0]
    if not cands:
        return hw_padded
    best = cands[0]
    for t in cands:
        if b * (hw_padded // t) >= 8:
            best = t
    return best


class PositionalEncodingFourierPallas:
    def __init__(self, hidden_dim=32, dim=128, temperature=10000, key=None,
                 out_dtype=jnp.float32, mxu_dtype=None):
        self.hidden_dim = hidden_dim
        self.dim = dim
        self.temperature = float(temperature)
        self.scale = 2.0 * math.pi
        self.out_dtype = out_dtype    # jnp.bfloat16 halves output HBM traffic
        self.mxu_dtype = mxu_dtype    # jnp.bfloat16 cuts MXU passes (v7x); opt-in
        if key is None:
            key = jax.random.PRNGKey(0)
        kw, kb = jax.random.split(key)
        # nn.Conv2d(hidden_dim*2, dim, kernel_size=1): weight (dim, 2*HD, 1, 1)
        self.weight = (
            jax.random.normal(kw, (dim, 2 * hidden_dim, 1, 1), jnp.float32) * 0.02
        )
        self.bias = jax.random.normal(kb, (dim,), jnp.float32) * 0.02

    def __call__(self, B, Hp, Wp, mask=None):
        HD, D = self.hidden_dim, self.dim
        HD2 = 2 * HD
        eps = 1e-6

        # ---- glue: embeds (tiny data prep, stays in XLA) ----
        if mask is None:
            # closed form == cumsum of ones, normalized (identical numerics)
            ys = jnp.arange(1, Hp + 1, dtype=jnp.float32)
            xs = jnp.arange(1, Wp + 1, dtype=jnp.float32)
            ys = ys / (jnp.float32(Hp) + jnp.float32(eps)) * self.scale
            xs = xs / (jnp.float32(Wp) + jnp.float32(eps)) * self.scale
            y_embed = jnp.broadcast_to(ys[None, :, None], (B, Hp, Wp))
            x_embed = jnp.broadcast_to(xs[None, None, :], (B, Hp, Wp))
        else:
            not_mask = (~mask.reshape(B, Hp, Wp)).astype(jnp.float32)
            y_embed = jnp.cumsum(not_mask, axis=1, dtype=jnp.float32)
            x_embed = jnp.cumsum(not_mask, axis=2, dtype=jnp.float32)
            y_embed = y_embed / (y_embed[:, -1:, :] + eps) * self.scale
            x_embed = x_embed / (x_embed[:, :, -1:] + eps) * self.scale

        HW = Hp * Wp
        HWp = pl.cdiv(HW, 128) * 128   # == HW when HW is 128-aligned (no pad)

        # channel-major per-pixel inputs: (B, 2, HW)
        yx = jnp.stack(
            [y_embed.reshape(B, HW), x_embed.reshape(B, HW)], axis=1)
        if HWp != HW:
            # ragged spatial extent: lane-axis pad (sliced off after the kernel)
            yx = jnp.pad(yx, ((0, 0), (0, 0), (0, HWp - HW)))

        # ---- packed grid-invariant constants ----
        dim_t = jnp.arange(HD, dtype=jnp.float32)
        dim_t = self.temperature ** (2.0 * jnp.floor(dim_t / 2.0) / HD)
        inv_dim_t = 1.0 / dim_t                                       # (HD,)
        ay = jnp.concatenate([inv_dim_t, jnp.zeros((HD,), jnp.float32)])
        ax = jnp.concatenate([jnp.zeros((HD,), jnp.float32), inv_dim_t])
        ph = (jnp.arange(HD2) % 2).astype(jnp.float32) * (math.pi / 2.0)
        C = max(HD2, D)
        cst = jnp.zeros((C, 4), jnp.float32)
        cst = cst.at[:HD2, 0].set(ay)
        cst = cst.at[:HD2, 1].set(ax)
        cst = cst.at[:HD2, 2].set(ph)
        cst = cst.at[:D, 3].set(self.bias)
        w = self.weight.reshape(D, HD2)

        TILE = _pick_tile(HWp, B)
        grid = (B, HWp // TILE)
        out_bytes = jnp.dtype(self.out_dtype).itemsize

        kernel = functools.partial(
            _pos_enc_kernel, hd2=HD2, d=D, mxu_dtype=self.mxu_dtype)

        # ---- Pallas kernel: fourier features + 1x1-conv matmul, NCHW-flat out ----
        out = pl.pallas_call(
            kernel,
            out_shape=jax.ShapeDtypeStruct((B, D, HWp), self.out_dtype),
            grid_spec=pltpu.PrefetchScalarGridSpec(
                num_scalar_prefetch=0,
                grid=grid,
                in_specs=[
                    pl.BlockSpec((1, 2, TILE), lambda b, i: (b, 0, i)),  # yx
                    pl.BlockSpec((C, 4), lambda b, i: (0, 0)),           # consts
                    pl.BlockSpec((D, HD2), lambda b, i: (0, 0)),         # weight
                ],
                out_specs=pl.BlockSpec((1, D, TILE), lambda b, i: (b, 0, i)),
            ),
            compiler_params=pltpu.CompilerParams(
                dimension_semantics=("parallel", "parallel")),
            cost_estimate=pl.CostEstimate(
                flops=2 * B * HWp * HD2 * D,
                transcendentals=B * HWp * HD2,
                bytes_accessed=B * HWp * (2 * 4 + D * out_bytes)
                + (C * 4 + D * HD2) * 4,
            ),
        )(yx, cst, w)

        if HWp != HW:
            out = out[:, :, :HW]          # only on the ragged-HW fallback path
        # pure metadata reshape: kernel output is already channel-major (NCHW)
        return out.reshape(B, D, Hp, Wp)

    # pure-JAX reference (torch-faithful) for verification
    def reference(self, B, Hp, Wp, mask=None):
        HD, D = self.hidden_dim, self.dim
        if mask is None:
            not_mask = jnp.ones((B, Hp, Wp), jnp.float32)
        else:
            not_mask = (~mask.reshape(B, Hp, Wp)).astype(jnp.float32)
        y_embed = jnp.cumsum(not_mask, axis=1, dtype=jnp.float32)
        x_embed = jnp.cumsum(not_mask, axis=2, dtype=jnp.float32)
        eps = 1e-6
        y_embed = y_embed / (y_embed[:, -1:, :] + eps) * self.scale
        x_embed = x_embed / (x_embed[:, :, -1:] + eps) * self.scale
        dim_t = jnp.arange(HD, dtype=jnp.float32)
        dim_t = self.temperature ** (2.0 * jnp.floor(dim_t / 2.0) / HD)
        pos_x = x_embed[..., None] / dim_t
        pos_y = y_embed[..., None] / dim_t
        px = jnp.stack(
            (jnp.sin(pos_x[..., 0::2]), jnp.cos(pos_x[..., 1::2])), axis=4
        ).reshape(B, Hp, Wp, HD)
        py = jnp.stack(
            (jnp.sin(pos_y[..., 0::2]), jnp.cos(pos_y[..., 1::2])), axis=4
        ).reshape(B, Hp, Wp, HD)
        pos = jnp.concatenate((py, px), axis=3)            # (B, Hp, Wp, 2*HD)
        w = self.weight.reshape(D, 2 * HD)
        out = jnp.einsum("bhwc,dc->bhwd", pos, w) + self.bias
        return jnp.transpose(out, (0, 3, 1, 2))


if __name__ == "__main__":
    B, Hp, Wp = 2, 16, 16
    hidden_dim, dim = 32, 128

    module = PositionalEncodingFourierPallas(
        hidden_dim=hidden_dim, dim=dim, temperature=10000,
        key=jax.random.PRNGKey(0),
    )

    # mask=None path (closed-form embeds)
    out = module(B, Hp, Wp)
    out = jax.block_until_ready(out)
    assert out.shape == (B, dim, Hp, Wp), out.shape
    ref = module.reference(B, Hp, Wp)
    assert jnp.allclose(out, ref, atol=1e-4, rtol=1e-4), (
        float(jnp.max(jnp.abs(out - ref)))
    )

    # masked path (cumsum embeds), same kernel
    mask = jax.random.bernoulli(jax.random.PRNGKey(1), 0.25, (B, Hp, Wp))
    out_m = jax.block_until_ready(module(B, Hp, Wp, mask=mask))
    ref_m = module.reference(B, Hp, Wp, mask=mask)
    assert jnp.allclose(out_m, ref_m, atol=1e-4, rtol=1e-4), (
        float(jnp.max(jnp.abs(out_m - ref_m)))
    )

    print("KERNEL_OK")
</pallas_src>

<mosaic_0001>
module attributes {stable_mosaic.version = 11 : i64} {
  func.func @_pos_enc_kernel(%arg0: i32, %arg1: i32, %arg2: memref<1x2x128xf32, #tpu.memory_space<vmem>>, %arg3: memref<128x4xf32, #tpu.memory_space<vmem>>, %arg4: memref<128x64xf32, #tpu.memory_space<vmem>>, %arg5: memref<1x128x128xf32, #tpu.memory_space<vmem>>) attributes {dimension_semantics = [#tpu.dimension_semantics<parallel>, #tpu.dimension_semantics<parallel>], iteration_bounds = array<i64: 2, 2>, scalar_prefetch = 0 : i64, scratch_operands = 0 : i64, tpu.core_type = #tpu.core_type<tc>, window_params = [{transform_indices = @transform_0, window_bounds = array<i64: 1, 2, 128>}, {pipeline_mode = #tpu.pipeline_mode<synchronous>, transform_indices = @transform_1, window_bounds = array<i64: 128, 4>}, {pipeline_mode = #tpu.pipeline_mode<synchronous>, transform_indices = @transform_2, window_bounds = array<i64: 128, 64>}, {transform_indices = @transform_3, window_bounds = array<i64: 1, 128, 128>}]} {
    %c0 = arith.constant 0 : index
    %c0_0 = arith.constant 0 : index
    %c0_1 = arith.constant 0 : index
    %0 = vector.load %arg2[%c0, %c0_0, %c0_1] : memref<1x2x128xf32, #tpu.memory_space<vmem>>, vector<1x1x128xf32>
    %1 = vector.shape_cast %0 : vector<1x1x128xf32> to vector<1x128xf32>
    %c0_2 = arith.constant 0 : index
    %c1 = arith.constant 1 : index
    %c0_3 = arith.constant 0 : index
    %2 = vector.load %arg2[%c0_2, %c1, %c0_3] : memref<1x2x128xf32, #tpu.memory_space<vmem>>, vector<1x1x128xf32>
    %3 = vector.shape_cast %2 : vector<1x1x128xf32> to vector<1x128xf32>
    %c0_4 = arith.constant 0 : index
    %c0_5 = arith.constant 0 : index
    %4 = vector.load %arg3[%c0_4, %c0_5] : memref<128x4xf32, #tpu.memory_space<vmem>>, vector<64x1xf32>
    %c0_6 = arith.constant 0 : index
    %c1_7 = arith.constant 1 : index
    %5 = vector.load %arg3[%c0_6, %c1_7] : memref<128x4xf32, #tpu.memory_space<vmem>>, vector<64x1xf32>
    %c0_8 = arith.constant 0 : index
    %c2 = arith.constant 2 : index
    %6 = vector.load %arg3[%c0_8, %c2] : memref<128x4xf32, #tpu.memory_space<vmem>>, vector<64x1xf32>
    %c0_9 = arith.constant 0 : index
    %c3 = arith.constant 3 : index
    %7 = vector.load %arg3[%c0_9, %c3] : memref<128x4xf32, #tpu.memory_space<vmem>>, vector<128x1xf32>
    %8 = vector.broadcast %4 : vector<64x1xf32> to vector<64x128xf32>
    %9 = vector.broadcast %1 : vector<1x128xf32> to vector<64x128xf32>
    %10 = arith.mulf %8, %9 : vector<64x128xf32>
    %11 = vector.broadcast %5 : vector<64x1xf32> to vector<64x128xf32>
    %12 = vector.broadcast %3 : vector<1x128xf32> to vector<64x128xf32>
    %13 = arith.mulf %11, %12 : vector<64x128xf32>
    %14 = arith.addf %10, %13 : vector<64x128xf32>
    %15 = vector.broadcast %6 : vector<64x1xf32> to vector<64x128xf32>
    %16 = arith.addf %14, %15 : vector<64x128xf32>
    %17 = math.sin %16 : vector<64x128xf32>
    %c0_10 = arith.constant 0 : index
    %c0_11 = arith.constant 0 : index
    %18 = vector.load %arg4[%c0_10, %c0_11] : memref<128x64xf32, #tpu.memory_space<vmem>>, vector<128x64xf32>
    %cst = arith.constant dense<0.000000e+00> : vector<128x128xf32>
    %19 = tpu.matmul %18, %17, %cst {dimension_numbers = #tpu.dot_dimension_numbers<[1], [0], [0], [1], [0, 0, 1, 1], [], []>} : vector<128x64xf32>, vector<64x128xf32>, vector<128x128xf32> -> vector<128x128xf32>
    %20 = vector.broadcast %7 : vector<128x1xf32> to vector<128x128xf32>
    %21 = arith.addf %19, %20 : vector<128x128xf32>
    %c0_12 = arith.constant 0 : index
    %c0_13 = arith.constant 0 : index
    %c0_14 = arith.constant 0 : index
    %22 = vector.load %arg5[%c0_12, %c0_13, %c0_14] : memref<1x128x128xf32, #tpu.memory_space<vmem>>, vector<1x128x128xf32>
    %23 = vector.shape_cast %22 : vector<1x128x128xf32> to vector<128x128xf32>
    %24 = vector.shape_cast %21 : vector<128x128xf32> to vector<1x128x128xf32>
    tpu.vector_store %arg5[%c0_12, %c0_13, %c0_14], %24 {strides = array<i32>} : memref<1x128x128xf32, #tpu.memory_space<vmem>>, vector<1x128x128xf32>,
    return
  }
  func.func @transform_0(%arg0: i32, %arg1: i32) -> (i32, i32, i32) {
    %c0_i32 = arith.constant 0 : i32
    %c0_i32_0 = arith.constant 0 : i32
    return %arg0, %c0_i32, %arg1 : i32, i32, i32
  }
  func.func @transform_1(%arg0: i32, %arg1: i32) -> (i32, i32) {
    %c0_i32 = arith.constant 0 : i32
    %c0_i32_0 = arith.constant 0 : i32
    %c0_i32_1 = arith.constant 0 : i32
    return %c0_i32, %c0_i32_0 : i32, i32
  }
  func.func @transform_2(%arg0: i32, %arg1: i32) -> (i32, i32) {
    %c0_i32 = arith.constant 0 : i32
    %c0_i32_0 = arith.constant 0 : i32
    %c0_i32_1 = arith.constant 0 : i32
    return %c0_i32, %c0_i32_0 : i32, i32
  }
  func.func @transform_3(%arg0: i32, %arg1: i32) -> (i32, i32, i32) {
    %c0_i32 = arith.constant 0 : i32
    %c0_i32_0 = arith.constant 0 : i32
    return %arg0, %c0_i32, %arg1 : i32, i32, i32
  }
}

</mosaic_0001>

<bundles_post_ra>
// kernel: tpu_custom_call.1
= control target key start
LH: loop header
LB: loop body
LE: loop exit
PB: predicated region body
PF: predicated region fallthrough
CT: control target
= control target key end

     0   :  { %8 = vsyncpa [#allocation3], 0  ;;  %s3080_s0 = inlined_call_operand.vmem [shape: f32[2,2,256], index: 0, kind: input, shape index: {}]   ;;  %s3081_s1 = inlined_call_operand.vmem [shape: f32[128,4], index: 1, kind: input, shape index: {}]   ;;  %s3082_s2 = inlined_call_operand.vmem [shape: f32[128,64], index: 2, kind: input, shape index: {}]   ;;  %s3083_s3 = inlined_call_operand.hbm [shape: f32[2,128,256], index: 3, kind: output, shape index: {}]  }
   0x1   :  { %10 = vsyncpa [#allocation3 + $0x1], 0  ;;  %s2034_s12 = smov 0   ;;  %s2036_s13 = smov 0  }
   0x2   :  { %s2038_s14 = smov 0   ;;  %s2040_s15 = smov 0  }
   0x3   :  { %s2042_s16 = smov 0   ;;  %s2044_s17 = smov 0  }
   0x4   :  { %s2046_s18 = smov 0   ;;  %s2048_s19 = smov 0  }
   0x5 LB: > { %s1582_s20 = sadd.s32 4294967295, %s1998_s19   ;;  %s1583_s21 = sadd.s32 4294967294, %s1998_s19   ;;  %s1998_s19 = sphi %s2048_s19, %s16_s19   ;;  %s1994_s18 = sphi %s2046_s18, %s3108_s18   ;;  %s1990_s17 = sphi %s2044_s17, %s3107_s17   ;;  %s1986_s16 = sphi %s2042_s16, %s3106_s16   ;;  %s1982_s15 = sphi %s2040_s15, %s3105_s15   ;;  %s1978_s14 = sphi %s2038_s14, %s3104_s14   ;;  %s1974_s13 = sphi %s2036_s13, %s3103_s13   ;;  %s1970_s12 = sphi %s2034_s12, %s3102_s12  }
   0x6   : > { %s25_s22 = sadd.s32 1, %s1990_s17  ;;  %s28_s23 = sadd.s32 1, %s1994_s18 }
   0x7   : > { %p26_p0 = scmp.ge.s32.totalorder %s25_s22, 2  ;;  %p117_p1 = scmp.ne.s32.totalorder %s1978_s14, %s1974_s13 }
   0x8   : > { %p118_p2 = scmp.eq.s32.totalorder %s1582_s20, 3  ;;  %p123_p5 = scmp.ne.s32.totalorder %s1974_s13, %s1970_s12 }
   0x9   : > { %s3110_s22 = smov (%p26_p0, %s25_s22), 0  ;;  %s3112_s23 = smov (!%p26_p0, %s28_s23), %s1994_s18 }
   0xa   : > { %s103_s24 = ssub.s32 %s1990_s17, %s3110_s22  ;;  %p2085_p3 = por %p118_p2, %p117_p1 }
   0xb   : > { %p30_p4 = scmp.ge.s32.totalorder %s3112_s23, 2  ;;  %p124_p6 = scmp.eq.s32.totalorder %s1583_s21, 3 }
   0xc   : > { %p1586_p7 = scmp.ge.s32.totalorder %s1998_s19, 1  ;;  %p159_p9 = scmp.lt.s32.totalorder %s1998_s19, 5 }
   0xd   : > { %s3114_s23 = smov (%p30_p4, %s3112_s23), 0  ;;  %p2094_p8 = por %p124_p6, %p123_p5 }
   0xe   : > { %s102_s27 = ssub.s32 %s1994_s18, %s3114_s23  ;;  %s107_s28 = sadd.s32 1, %s1978_s14 }
   0xf   : > { %s104_s29 = sor.u32 %s103_s24, %s102_s27  ;;  %p160_p10 = pnand %p1586_p7, %p159_p9 }
  0x10   : > { %p105_p11 = scmp.eq.s32.totalorder %s104_s29, 0  ;;  %v196_v0 = vld [vmem:[%s3081_s1] sm:$0xff] (!%p160_p10)  ;;  %v2000_v1 = vmov (!%p160_p10), 1   ;;  %v2001_v2 = vmov (!%p160_p10), 0   ;;  %v197_v3 = vld [vmem:[%s3081_s1 + $0x8] sm:$0xff] (!%p160_p10)  ;;  %v198_v4 = vld [vmem:[%s3081_s1 + $0x10] sm:$0xff] (!%p160_p10) }
  0x11   : > { %163 = sbr.rel (%p160_p10) target bundleno = 650 (0x28a), region = 32  ;;  %1850 = vset.pattern.permute.xlu1 (!%p160_p10), %v2000_v1  ;;  %1849 = vset.pattern.permute.xlu0 (!%p160_p10), %v2001_v2  ;;  %v199_v5 = vld [vmem:[%s3081_s1 + $0x18] sm:$0xff] (!%p160_p10)  ;;  %v200_v6 = vld [vmem:[%s3081_s1 + $0x20] sm:$0xff] (!%p160_p10)  ;;  %v2002_v7 = vmov (!%p160_p10), 2   ;;  %v202_v8 = vld [vmem:[%s3081_s1 + $0x30] sm:$0xff] (!%p160_p10)  ;;  %p186_p12 = scmp.lt.s32.totalorder (!%p160_p10), %s1986_s16, 1 }
  0x12   : > { %s2103_s30 = scalar_select %p105_p11, %s1978_s14, %s107_s28  }
  0x13   : > { %265 = vperm.xlu1 (!%p160_p10), %1850, %v196_v0   ;;  %214 = vperm.xlu0 (!%p160_p10), %1849, %v196_v0   ;;  %v201_v9 = vld [vmem:[%s3081_s1 + $0x28] sm:$0xff] (!%p160_p10)  ;;  %v203_v10 = vld [vmem:[%s3081_s1 + $0x38] sm:$0xff] (!%p160_p10)  ;;  %p188_p13 = scmp.lt.s32.totalorder (!%p160_p10), %s1982_s15, 1  ;;  %v2003_v56 = vmov (!%p160_p10), 683565275   ;;  %s1641_s11 = sshll.u32 (!%p160_p10), %s1986_s16, 5 }
  0x14   : > { %v2004_v58 = vmov (!%p160_p10), 2475754826   ;;  %v2005_v60 = vmov (!%p160_p10), 2131351028   ;;  %v2006_v62 = vmov (!%p160_p10), 2102212464   ;;  %s1498_s20 = sadd.s32 (!%p160_p10), %s1982_s15, %s1641_s11 }
  0x15   : > { %s2010_s4 = smov (!%p160_p10), [#allocation2]  }
  0x16   : > { %s1908_s5 = sshll.u32 (!%p160_p10), %s2010_s4, 4  ;;  %s1909_s5 = int_to_ptr.vmem [resolvable:$false] %s1908_s5 }
  0x17   : > { %269 = vperm.xlu1 (!%p160_p10), %1850, %v197_v3   ;;  %219 = vperm.xlu0 (!%p160_p10), %1849, %v197_v3  }
  0x18   : > { %s187_s6 = scalar_select %p186_p12, %s1986_s16, 1 }
  0x19   : > { %s189_s7 = scalar_select %p188_p13, %s1982_s15, 1 }
  0x1a   : > { %s1588_s8 = sshll.u32 %s187_s6, 1  ;;  %s1910_s6 = scalar_lea.vmem %s1909_s5, 4096 }
  0x1b   : > { %1851 = vset.pattern.permute.xlu1 %v2001_v2  ;;  %224 = vperm.xlu0 %1849, %v198_v4   ;;  %s191_s9 = sadd.s32 %s1588_s8, %s189_s7  ;;  %s183_s8 = sand.u32 1, %s1974_s13  }
  0x1c   : > { %229 = vperm.xlu1 %1851, %v199_v5   ;;  %s1589_s10 = sshll.u32 %s191_s9, 1  ;;  %s1587_s9 = sshll.u32 %s183_s8, 7 }
  0x1d   : > { %s193_s21 = scalar_lea.vmem %s3080_s0, %s1589_s10  ;;  %s2998_s10 = scalar_lea.vmem [#allocation2], %s1587_s9 }
  0x1e   : > { %v2138_v17 = vld [vmem:[%s193_s21 + $0x1] ss:$0 sm:$0xff]  ;;  %v2140_v18 = vld [vmem:[%s193_s21] ss:$0 sm:$0xff]  ;;  %s1501_s16 = sshll.u32 %s2998_s10, 4  ;;  %s1642_s21 = sshll.u32 %s1498_s20, 7  ;;  %s3015_s16 = int_to_ptr.vmem [resolvable:$true] %s1501_s16 }
  0x1f   : > { %1852 = vset.pattern.permute.xlu0 %v2000_v1  ;;  %s3020_s27 = scalar_lea.hbm %s3083_s3, %s1642_s21  ;;  %s3028_s28 = scalar_lea.sflag [#allocation3], %s183_s8 }
  0x20   : > { %1853 = vset.pattern.permute.xlu1 %v2000_v1  ;;  %273 = vperm.xlu0 %1852, %v198_v4   ;;  %s1904_s29 = scalar_lea.vmem %s3015_s16, 2048  ;;  %p1911_p4 = scmp.lt.s32.totalorder %s3015_s16, %s1909_s5 }
  0x21   : > { %277 = vperm.xlu1 %1853, %v199_v5   ;;  %p1905_p0 = scmp.ne.s32.totalorder %s3015_s16, %s1904_s29  ;;  %p1912_p5 = scmp.lt.s32.totalorder %s1910_s6, %s1904_s29 }
  0x23   : > { %p1906_p1 = pnand %p1905_p0, %p2085_p3  ;;  %p1913_p6 = por %p1912_p5, %p1911_p4 }
  0x24   : > { %281 = vperm.xlu0 %1852, %v200_v6  }
  0x25   : > { %1854 = vset.pattern.permute.xlu1 %v2002_v7  ;;  %p1907_p2 = pneg %p1906_p1 }
  0x26   : > { %317 = vperm.xlu1 %1854, %v196_v0  }
  0x27   : > { %p1914_p7 = pnand %p1913_p6, %p1907_p2 }
  0x28   : > { %289 = vperm.xlu0 %1852, %v202_v8  }
  0x2a   : > { %1855 = vset.pattern.permute.xlu1 %v2001_v2 }
  0x2b   : > { %234 = vperm.xlu1 %1855, %v200_v6  }
  0x2c   : > { %1859 = vset.pattern.permute.xlu0 %v2002_v7 }
  0x2d   : > { %321 = vperm.xlu0 %1859, %v197_v3   ;;  %v2007_v3 = vmov 920167782  }
  0x2f   : > { %239 = vperm.xlu1 %1855, %v201_v9  }
  0x31   : > { %329 = vperm.xlu0 %1859, %v199_v5  }
  0x33   : > { %1856 = vset.pattern.permute.xlu1 %v2000_v1 }
  0x34   : > { %285 = vperm.xlu1 %1856, %v201_v9  }
  0x35   : > { %337 = vperm.xlu0 %1859, %v201_v9  }
  0x38   : > { %1857 = vset.pattern.permute.xlu1 %v2002_v7 }
  0x39   : > { %325 = vperm.xlu1 %1857, %v198_v4  }
  0x3d   : > { %1858 = vset.pattern.permute.xlu1 %v2001_v2 }
  0x3e   : > { %244 = vperm.xlu1 %1858, %v202_v8  }
  0x42   : > { %249 = vperm.xlu1 %1858, %v203_v10  }
  0x46   : > { %1860 = vset.pattern.permute.xlu1 %v2000_v1 }
  0x47   : > { %293 = vperm.xlu1 %1860, %v203_v10  }
  0x4b   : > { %1861 = vset.pattern.permute.xlu1 %v2002_v7  ;;  %v2008_v7 = vmov 1326507024  }
  0x4c   : > { %333 = vperm.xlu1 %1861, %v200_v6  }
  0x50   : > { %341 = vperm.xlu1 %1861, %v202_v8  }
  0x54   : > { %345 = vperm.xlu1 %1861, %v203_v10  }
  0x92   : > { %v266_v11 = vpop.permute.xlu1 %265  ;;  %v215_v12 = vpop.permute.xlu0 %214 }
  0x93   : > { %v300_v20 = vmul.f32 %v2138_v17, %v266_v11  ;;  %v256_v21 = vmul.f32 %v2140_v18, %v215_v12 }
  0x95   : > { %v308_v24 = vadd.f32 %v300_v20, %v256_v21 }
  0x96   : > { %v270_v13 = vpop.permute.xlu1 %269  ;;  %v220_v14 = vpop.permute.xlu0 %219 }
  0x97   : > { %v301_v27 = vmul.f32 %v2138_v17, %v270_v13  ;;  %v257_v28 = vmul.f32 %v2140_v18, %v220_v14 }
  0x99   : > { %v309_v34 = vadd.f32 %v301_v27, %v257_v28 }
  0x9a   : > { %v2136_v15 = vpop.permute.xlu0 %224 }
  0x9b   : > { %v230_v16 = vpop.permute.xlu1 %229 }
  0x9c   : > { %v259_v43 = vmul.f32 %v2140_v18, %v230_v16 }
  0x9f   : > { %v2142_v19 = vpop.permute.xlu0 %273 }
  0xa0   : > { %v278_v22 = vpop.permute.xlu1 %277 }
  0xa1   : > { %v303_v38 = vmul.f32 %v2138_v17, %v278_v22 }
  0xa3   : > { %v2146_v23 = vpop.permute.xlu0 %281  ;;  %v311_v49 = vadd.f32 %v303_v38, %v259_v43 }
  0xa5   : > { %v318_v25 = vpop.permute.xlu1 %317 }
  0xa6   : > { %v2148_v26 = vadd.f32 %v318_v25, %v308_v24 }
  0xa7   : > { %v2152_v29 = vpop.permute.xlu0 %289 }
  0xa8   : > { %v356_v30 = vand.u32 2147483647, %v2148_v26  ;;  %v359_v31 = vand.u32 2139095040, %v2148_v26 }
  0xaa   : > { %v360_v32 = vshrl.u32 %v359_v31, 23  ;;  %v363_v33 = vand.u32 8388607, %v356_v30  ;;  %v2192_v43 = vpop.permute.xlu1 %234 }
  0xac   : > { %v1592_v35 = vadd.s32 4294967169, %v360_v32  ;;  %v322_v36 = vpop.permute.xlu0 %321  ;;  %v364_v40 = vor.u32 8388608, %v363_v33 }
  0xad   : > { %v2158_v37 = vadd.f32 %v322_v36, %v309_v34 }
  0xae   : > { %v366_v39 = vadd.s32 1, %v1592_v35  ;;  %v2166_v51 = vshll.u32 %v364_v40, 8 }
  0xaf   : > { %v460_v41 = vand.u32 2147483647, %v2158_v37  ;;  %v463_v42 = vand.u32 2139095040, %v2158_v37 }
  0xb0   : > { %vm367_vm0 = vcmp.gt.s32.totalorder %v366_v39, 0  ;;  %v330_v47 = vpop.permute.xlu0 %329 }
  0xb1   : > { %v368_v44 = vsel %vm367_vm0, %v366_v39, 0  ;;  %v464_v45 = vshrl.u32 %v463_v42, 23  ;;  %v467_v46 = vand.u32 8388607, %v460_v41  ;;  %v2168_v55 = vadd.f32 %v330_v47, %v311_v49 }
  0xb2   : > { %v370_v48 = vand.u32 31, %v368_v44  ;;  %v369_v50 = vshrl.u32 %v368_v44, 5 }
  0xb3   : > { %v1596_v53 = vadd.s32 4294967169, %v464_v45  ;;  %v468_v54 = vor.u32 8388608, %v467_v46  ;;  %v668_v47 = vand.u32 2147483647, %v2168_v55 }
  0xb4   : > { %v371_v52 = vsub.s32 32, %v370_v48  ;;  %v373_v57 = vshll.u32 %v2003_v56, %v370_v48  ;;  %v376_v59 = vshll.u32 %v2004_v58, %v370_v48  ;;  %v379_v61 = vshll.u32 %v2005_v60, %v370_v48 }
  0xb5   : > { %v382_v63 = vshll.u32 %v2006_v62, %v370_v48  ;;  %v385_v4 = vshll.u32 %v2007_v3, %v370_v48  ;;  %vm388_vm1 = vcmp.lt.s32.totalorder %v369_v50, 1  ;;  %v470_v12 = vadd.s32 1, %v1596_v53 }
  0xb6   : > { %v374_v0 = vshrl.u32 %v2004_v58, %v371_v52  ;;  %v377_v1 = vshrl.u32 %v2005_v60, %v371_v52  ;;  %v380_v2 = vshrl.u32 %v2006_v62, %v371_v52  ;;  %v372_v5 = vshrl.u32 %v2003_v56, %v371_v52 }
  0xb7   : > { %v383_v6 = vshrl.u32 %v2007_v3, %v371_v52  ;;  %v386_v8 = vshrl.u32 %v2008_v7, %v371_v52  ;;  %vm390_vm2 = vcmp.lt.s32.totalorder %v369_v50, 3  ;;  %vm391_vm3 = vcmp.lt.s32.totalorder %v369_v50, 4 }
  0xb8   : > { %v375_v9 = vor.u32 %v374_v0, %v373_v57  ;;  %v378_v10 = vor.u32 %v377_v1, %v376_v59  ;;  %v381_v11 = vor.u32 %v380_v2, %v379_v61  ;;  %vm471_vm4 = vcmp.gt.s32.totalorder %v470_v12, 0 }
  0xb9   : > { %v384_v13 = vor.u32 %v383_v6, %v382_v63  ;;  %v387_v14 = vor.u32 %v386_v8, %v385_v4  ;;  %vm389_vm5 = vcmp.lt.s32.totalorder %v369_v50, 2  ;;  %v472_v32 = vsel %vm471_vm4, %v470_v12, 0 }
  0xba   : > { %v392_v16 = vsel %vm388_vm1, %v372_v5, %v375_v9  ;;  %v393_v20 = vsel %vm391_vm3, %v381_v11, 2102212464  ;;  %v396_v21 = vsel %vm388_vm1, %v375_v9, %v378_v10  ;;  %v400_v22 = vsel %vm388_vm1, %v378_v10, %v381_v11  ;;  %v240_v9 = vpop.permute.xlu1 %239 }
  0xbb   : > { %v394_v24 = vsel %vm390_vm2, %v378_v10, %v393_v20  ;;  %v397_v25 = vsel %vm391_vm3, %v384_v13, 920167782  ;;  %v401_v27 = vsel %vm391_vm3, %v387_v14, 1326507024  ;;  %v2181_v36 = vshrl.u32 %v472_v32, 5 }
  0xbc   : > { %v398_v28 = vsel %vm390_vm2, %v381_v11, %v397_v25  ;;  %v402_v31 = vsel %vm390_vm2, %v384_v13, %v401_v27  ;;  %v395_v33 = vsel %vm389_vm5, %v392_v16, %v394_v24  ;;  %v474_v44 = vand.u32 31, %v472_v32 }
  0xbd   : > { %v399_v34 = vsel %vm389_vm5, %v396_v21, %v398_v28  ;;  %v403_v35 = vsel %vm389_vm5, %v400_v22, %v402_v31  ;;  %v411_v45 = vmul.u32 %v2166_v51, %v395_v33  ;;  %v2195_v46 = vshll.u32 %v468_v54, 8 }
  0xbe   : > { %v2184_v38 = vmul.u32.u64.low %v2166_v51, %v403_v35  ;;  %v2185_v39 = vmul.u32.u64.high %v2166_v51, %v403_v35, %v2184_v38  ;;  %v2188_v40 = vmul.u32.u64.low %v2166_v51, %v399_v34  ;;  %v2189_v42 = vmul.u32.u64.high %v2166_v51, %v399_v34, %v2188_v40 }
  0xbf   : > { %v475_v48 = vsub.s32 32, %v474_v44  ;;  %v477_v49 = vshll.u32 %v2003_v56, %v474_v44  ;;  %vm492_vm6 = vcmp.lt.s32.totalorder %v2181_v36, 1  ;;  %v671_v50 = vand.u32 2139095040, %v2168_v55 }
  0xc0   : > { %vm413_vm7 = vc.u32 %v2185_v39, %v2188_v40  ;;  %v414_v52 = vadd.s32 1, %v2189_v42  ;;  %v480_v53 = vshll.u32 %v2004_v58, %v474_v44  ;;  %v483_v51 = vshll.u32 %v2005_v60, %v474_v44 }
  0xc1   : > { %v478_v54 = vshrl.u32 %v2004_v58, %v475_v48  ;;  %v481_v57 = vshrl.u32 %v2005_v60, %v475_v48  ;;  %v484_v59 = vshrl.u32 %v2006_v62, %v475_v48  ;;  %v486_v61 = vshll.u32 %v2006_v62, %v474_v44 }
  0xc2   : > { %v415_v63 = vsel %vm413_vm7, %v414_v52, %v2189_v42  ;;  %v487_v0 = vshrl.u32 %v2007_v3, %v475_v48  ;;  %v489_v1 = vshll.u32 %v2007_v3, %v474_v44  ;;  %v490_v2 = vshrl.u32 %v2008_v7, %v475_v48 }
  0xc3   : > { %v416_v4 = vadd.s32 %v415_v63, %v411_v45  ;;  %v479_v5 = vor.u32 %v478_v54, %v477_v49  ;;  %v482_v6 = vor.u32 %v481_v57, %v480_v53  ;;  %v485_v8 = vor.u32 %v484_v59, %v483_v51  ;;  %v286_v45 = vpop.permute.xlu1 %285 }
  0xc4   : > { %v488_v10 = vor.u32 %v487_v0, %v486_v61  ;;  %v491_v11 = vor.u32 %v490_v2, %v489_v1  ;;  %vm494_vm8 = vcmp.lt.s32.totalorder %v2181_v36, 3  ;;  %v672_v12 = vshrl.u32 %v671_v50, 23 }
  0xc5   : > { %v417_v13 = vadd.s32 536870912, %v416_v4  ;;  %v476_v14 = vshrl.u32 %v2003_v56, %v475_v48  ;;  %vm495_vm9 = vcmp.lt.s32.totalorder %v2181_v36, 4  ;;  %v500_v16 = vsel %vm492_vm6, %v479_v5, %v482_v6 }
  0xc6   : > { %v497_v20 = vsel %vm495_vm9, %v485_v8, 2102212464  ;;  %v501_v21 = vsel %vm495_vm9, %v488_v10, 920167782  ;;  %v504_v22 = vsel %vm492_vm6, %v482_v6, %v485_v8  ;;  %v505_v24 = vsel %vm495_vm9, %v491_v11, 1326507024 }
  0xc7   : > { %v2221_v25 = vshrl.u32 %v417_v13, 30  ;;  %vm493_vm10 = vcmp.lt.s32.totalorder %v2181_v36, 2  ;;  %v502_v27 = vsel %vm494_vm8, %v485_v8, %v501_v21  ;;  %v506_v28 = vsel %vm494_vm8, %v488_v10, %v505_v24 }
  0xc8   : > { %v496_v31 = vsel %vm492_vm6, %v476_v14, %v479_v5  ;;  %v503_v32 = vsel %vm493_vm10, %v500_v16, %v502_v27  ;;  %v507_v33 = vsel %vm493_vm10, %v504_v22, %v506_v28  ;;  %v1604_v34 = vadd.s32 4294967169, %v672_v12 }
  0xc9   : > { %v419_v35 = vshll.u32 %v2221_v25, 30  ;;  %v498_v38 = vsel %vm494_vm8, %v482_v6, %v497_v20  ;;  %v2238_v42 = vmul.u32.u64.low %v2195_v46, %v507_v33  ;;  %v2239_v44 = vmul.u32.u64.high %v2195_v46, %v507_v33, %v2238_v42 }
  0xca   : > { %v2242_v48 = vmul.u32.u64.low %v2195_v46, %v503_v32  ;;  %v2243_v49 = vmul.u32.u64.high %v2195_v46, %v503_v32, %v2242_v48  ;;  %v675_v50 = vand.u32 8388607, %v668_v47  ;;  %v678_v52 = vadd.s32 1, %v1604_v34 }
  0xcb   : > { %v2248_v53 = vsub.s32 %v416_v4, %v419_v35  ;;  %v258_v51 = vmul.f32 %v2140_v18, %v2136_v15  ;;  %v302_v54 = vmul.f32 %v2138_v17, %v2142_v19  ;;  %v499_v57 = vsel %vm493_vm10, %v496_v31, %v498_v38  ;;  %v326_v4 = vpop.permute.xlu1 %325  ;;  %v338_v35 = vpop.permute.xlu0 %337 }
  0xcc   : > { %vm679_vm11 = vcmp.gt.s32.totalorder %v678_v52, 0  ;;  %vm517_vm12 = vc.u32 %v2239_v44, %v2242_v48  ;;  %v518_v61 = vadd.s32 1, %v2243_v49  ;;  %v676_v63 = vor.u32 8388608, %v675_v50 }
  0xcd   : > { %v422_v59 = vsub.s32 0, %v2248_v53  ;;  %v680_v0 = vsel %vm679_vm11, %v678_v52, 0  ;;  %v515_v15 = vmul.u32 %v2195_v46, %v499_v57  ;;  %v305_v19 = vmul.f32 %v2138_v17, %v286_v45 }
  0xce   : > { %v682_v2 = vand.u32 31, %v680_v0  ;;  %v2265_v36 = vmul.f32 %v2138_v17, %v2146_v23  ;;  %v2269_v5 = vmul.f32 %v2138_v17, %v2152_v29  ;;  %v519_v6 = vsel %vm517_vm12, %v518_v61, %v2243_v49 }
  0xcf   : > { %v1593_v1 = vmin.u32 %v422_v59, %v2248_v53  ;;  %v310_v8 = vadd.f32 %v302_v54, %v258_v51  ;;  %v520_v11 = vadd.s32 %v519_v6, %v515_v15  ;;  %v261_v12 = vmul.f32 %v2140_v18, %v240_v9 }
  0xd0   : > { %v683_v46 = vsub.s32 32, %v682_v2  ;;  %v412_v13 = vadd.s32 %v2188_v40, %v2185_v39  ;;  %v2277_v14 = vmul.f32 %v2140_v18, %v2192_v43  ;;  %v2279_v23 = vshll.u32 %v676_v63, 8 }
  0xd1   : > { %v424_v10 = vclz %v1593_v1  ;;  %v2281_v16 = vadd.f32 %v326_v4, %v310_v8  ;;  %v521_v20 = vadd.s32 536870912, %v520_v11  ;;  %v2283_v21 = vshrl.u32 %v680_v0, 5 }
  0xd2   : > { %v313_v22 = vadd.f32 %v305_v19, %v261_v12  ;;  %v686_v24 = vshrl.u32 %v2004_v58, %v683_v46  ;;  %v689_v9 = vshrl.u32 %v2005_v60, %v683_v46  ;;  %v692_v27 = vshrl.u32 %v2006_v62, %v683_v46  ;;  %v2305_v19 = vpop.permute.xlu1 %244 }
  0xd3   : > { %v1594_v29 = vadd.s32 4294967294, %v424_v10  ;;  %v695_v39 = vshrl.u32 %v2007_v3, %v683_v46  ;;  %v2289_v40 = vshrl.u32 %v521_v20, 30  ;;  %v685_v43 = vshll.u32 %v2003_v56, %v682_v2 }
  0xd4   : > { %v691_v28 = vshll.u32 %v2005_v60, %v682_v2  ;;  %v688_v32 = vshll.u32 %v2004_v58, %v682_v2  ;;  %v694_v33 = vshll.u32 %v2006_v62, %v682_v2  ;;  %v698_v34 = vshrl.u32 %v2008_v7, %v683_v46 }
  0xd5   : > { %vm1595_vm13 = vcmp.lt.s32.totalorder %v1594_v29, 0  ;;  %v523_v45 = vshll.u32 %v2289_v40, 30  ;;  %v687_v50 = vor.u32 %v686_v24, %v685_v43  ;;  %v697_v54 = vshll.u32 %v2007_v3, %v682_v2 }
  0xd6   : > { %v427_v31 = vsel %vm1595_vm13, 0, %v1594_v29  ;;  %v693_v49 = vor.u32 %v692_v27, %v691_v28  ;;  %v690_v52 = vor.u32 %v689_v9, %v688_v32  ;;  %v696_v51 = vor.u32 %v695_v39, %v694_v33  ;;  %v2327_v33 = vpop.permute.xlu1 %249 }
  0xd7   : > { %v428_v38 = vsub.s32 32, %v427_v31  ;;  %v432_v42 = vsub.s32 4294967266, %v427_v31  ;;  %v2298_v61 = vsub.s32 %v520_v11, %v523_v45  ;;  %v2300_v63 = vadd.f32 %v338_v35, %v313_v22 }
  0xd8   : > { %v429_v0 = vshll.u32 %v2248_v53, %v427_v31  ;;  %v684_v1 = vshrl.u32 %v2003_v56, %v683_v46  ;;  %v699_v15 = vor.u32 %v698_v34, %v697_v54  ;;  %vm703_vm14 = vcmp.lt.s32.totalorder %v2283_v21, 4 }
  0xd9   : > { %v430_v57 = vshrl.u32 %v412_v13, %v428_v38  ;;  %v433_v59 = vadd.s32 127, %v432_v42  ;;  %v526_v6 = vsub.s32 0, %v2298_v61  ;;  %vm700_vm15 = vcmp.lt.s32.totalorder %v2283_v21, 1 }
  0xda   : > { %v705_v2 = vsel %vm703_vm14, %v693_v49, 2102212464  ;;  %vm701_vm0 = vcmp.lt.s32.totalorder %v2283_v21, 2  ;;  %v708_v10 = vsel %vm700_vm15, %v687_v50, %v690_v52  ;;  %v709_v53 = vsel %vm703_vm14, %v696_v51, 920167782 }
  0xdb   : > { %v434_v4 = vshll.u32 %v433_v59, 23  ;;  %v431_v8 = vor.u32 %v430_v57, %v429_v0  ;;  %v1597_v12 = vmin.u32 %v526_v6, %v2298_v61  ;;  %vm702_vm1 = vcmp.lt.s32.totalorder %v2283_v21, 3 }
  0xdc   : > { %v712_v46 = vsel %vm700_vm15, %v690_v52, %v693_v49  ;;  %v704_v13 = vsel %vm700_vm15, %v684_v1, %v687_v50  ;;  %v706_v29 = vsel %vm702_vm1, %v690_v52, %v705_v2  ;;  %v710_v20 = vsel %vm702_vm1, %v693_v49, %v709_v53 }
  0xdd   : > { %v435_v11 = vor.u32 4788187, %v434_v4  ;;  %v713_v22 = vsel %vm703_vm14, %v699_v15, 1326507024  ;;  %vm358_vm2 = vcmp.lt.s32.totalorder %v2148_v26, 0  ;;  %v528_v9 = vclz %v1597_v12 }
  0xde   : > { %v711_v27 = vsel %vm701_vm0, %v708_v10, %v710_v20  ;;  %v714_v39 = vsel %vm702_vm1, %v696_v51, %v713_v22  ;;  %v438_v43 = vcvt.s32.f32 %v431_v8  ;;  %v876_v42 = vand.u32 2147483647, %v2300_v63 }
  0xdf   : > { %v436_v24 = vand.u32 2147483647, %v435_v11  ;;  %v715_v28 = vsel %vm701_vm0, %v712_v46, %v714_v39  ;;  %v2324_v31 = vmul.u32.u64.low %v2279_v23, %v711_v27  ;;  %v2325_v32 = vmul.u32.u64.high %v2279_v23, %v711_v27, %v2324_v31 }
  0xe0   : > { %v1598_v34 = vadd.s32 4294967294, %v528_v9  ;;  %v2330_v35 = vmul.u32.u64.low %v2279_v23, %v715_v28  ;;  %v2331_v38 = vmul.u32.u64.high %v2279_v23, %v715_v28, %v2330_v35  ;;  %vm2336_vm3 = vcmp.le.f32.partialorder %v356_v30, 0.7853982 }
  0xe1   : > { %v439_v49 = vmul.f32 %v438_v43, %v436_v24  ;;  %v707_v50 = vsel %vm701_vm0, %v704_v13, %v706_v29  ;;  %v879_v52 = vand.u32 2139095040, %v2300_v63  ;;  %vm462_vm4 = vcmp.lt.s32.totalorder %v2158_v37, 0 }
  0xe2   : > { %vm1599_vm5 = vcmp.lt.s32.totalorder %v1598_v34, 0  ;;  %v567_v51 = vand.u32 2139095040, %v2281_v16  ;;  %v312_v54 = vadd.f32 %v2265_v36, %v2277_v14  ;;  %v442_v57 = vsub.s32 4, %v2221_v25  ;;  %v2354_v36 = vpop.permute.xlu1 %293 }
  0xe3   : > { %v531_v30 = vsel %vm1599_vm5, 0, %v1598_v34  ;;  %v726_v59 = vadd.s32 1, %v2325_v32  ;;  %v880_v0 = vshrl.u32 %v879_v52, 23  ;;  %v546_v21 = vsub.s32 4, %v2289_v40 }
  0xe4   : > { %v536_v1 = vsub.s32 4294967266, %v531_v30  ;;  %v723_v15 = vmul.u32 %v2279_v23, %v707_v50  ;;  %v883_v4 = vand.u32 8388607, %v876_v42  ;;  %v440_v6 = vxor.u32 2147483648, %v439_v49 }
  0xe5   : > { %v532_v2 = vsub.s32 32, %v531_v30  ;;  %vm725_vm6 = vc.u32 %v2331_v38, %v2324_v31  ;;  %v1612_v8 = vadd.s32 4294967169, %v880_v0  ;;  %v564_v53 = vand.u32 2147483647, %v2281_v16 }
  0xe6   : > { %v537_v14 = vadd.s32 127, %v536_v1  ;;  %v727_v10 = vsel %vm725_vm6, %v726_v59, %v2325_v32  ;;  %v568_v11 = vshrl.u32 %v567_v51, 23  ;;  %v2361_v23 = vsel %vm358_vm2, %v442_v57, %v2221_v25  ;;  %v334_v34 = vpop.permute.xlu1 %333 }
  0xe7   : > { %v516_v12 = vadd.s32 %v2242_v48, %v2239_v44  ;;  %v728_v46 = vadd.s32 %v727_v10, %v723_v15  ;;  %v886_v13 = vadd.s32 1, %v1612_v8  ;;  %vm2367_vm7 = vcmp.le.f32.partialorder %v460_v41, 0.7853982 }
  0xe8   : > { %v538_v20 = vshll.u32 %v537_v14, 23  ;;  %v2374_v22 = vsel %vm462_vm4, %v546_v21, %v2289_v40  ;;  %v884_v24 = vor.u32 8388608, %v883_v4  ;;  %v441_v25 = vsel %vm358_vm2, %v440_v6, %v439_v49 }
  0xe9   : > { %v534_v9 = vshrl.u32 %v516_v12, %v532_v2  ;;  %v729_v44 = vadd.s32 536870912, %v728_v46  ;;  %vm887_vm8 = vcmp.gt.s32.totalorder %v886_v13, 0  ;;  %v445_v41 = vsel %vm2336_vm3, 0, %v2361_v23 }
  0xea   : > { %v888_v48 = vsel %vm887_vm8, %v886_v13, 0  ;;  %v1600_v27 = vadd.s32 4294967169, %v568_v11  ;;  %v571_v39 = vand.u32 8388607, %v564_v53  ;;  %v533_v43 = vshll.u32 %v2298_v61, %v531_v30 }
  0xeb   : > { %v539_v40 = vor.u32 4788187, %v538_v20  ;;  %v2384_v28 = vshrl.u32 %v729_v44, 30  ;;  %v890_v32 = vand.u32 31, %v888_v48  ;;  %v2389_v35 = vsel %vm2336_vm3, %v2148_v26, %v441_v25 }
  0xec   : > { %v549_v49 = vsel %vm2367_vm7, 0, %v2374_v22  ;;  %v2395_v50 = vadd.s32 %v2324_v31, %v2331_v38  ;;  %v2399_v61 = vmul.f32 %v2140_v18, %v2305_v19  ;;  %v535_v52 = vor.u32 %v534_v9, %v533_v43 }
  0xed   : > { %v731_v51 = vshll.u32 %v2384_v28, 30  ;;  %v891_v57 = vsub.s32 32, %v890_v32  ;;  %v2402_v30 = vshll.u32 %v884_v24, 8  ;;  %v889_v59 = vshrl.u32 %v888_v48, 5 }
  0xee   : > { %v572_v0 = vor.u32 8388608, %v571_v39  ;;  %v574_v1 = vadd.s32 1, %v1600_v27  ;;  %v2404_v21 = vadd.f32 %v334_v34, %v312_v54  ;;  %v540_v15 = vand.u32 2147483647, %v539_v40 }
  0xef   : > { %v2406_v4 = vsub.s32 %v728_v46, %v731_v51  ;;  %v893_v31 = vshll.u32 %v2003_v56, %v890_v32  ;;  %v894_v38 = vshrl.u32 %v2004_v58, %v891_v57  ;;  %v896_v19 = vshll.u32 %v2004_v58, %v890_v32 }
  0xf0   : > { %v897_v6 = vshrl.u32 %v2005_v60, %v891_v57  ;;  %v899_v2 = vshll.u32 %v2005_v60, %v890_v32  ;;  %v900_v8 = vshrl.u32 %v2006_v62, %v891_v57  ;;  %v542_v14 = vcvt.s32.f32 %v535_v52 }
  0xf1   : > { %v734_v10 = vsub.s32 0, %v2406_v4  ;;  %v902_v54 = vshll.u32 %v2006_v62, %v890_v32  ;;  %v903_v11 = vshrl.u32 %v2007_v3, %v891_v57  ;;  %v895_v12 = vor.u32 %v894_v38, %v893_v31 }
  0xf2   : > { %v898_v46 = vor.u32 %v897_v6, %v896_v19  ;;  %v901_v13 = vor.u32 %v900_v8, %v899_v2  ;;  %v2417_v20 = vshll.u32 %v572_v0, 8  ;;  %v905_v9 = vshll.u32 %v2007_v3, %v890_v32 }
  0xf3   : > { %v1605_v24 = vmin.u32 %v734_v10, %v2406_v4  ;;  %v904_v25 = vor.u32 %v903_v11, %v902_v54  ;;  %v906_v44 = vshrl.u32 %v2008_v7, %v891_v57  ;;  %v543_v48 = vmul.f32 %v542_v14, %v540_v15 }
  0xf4   : > { %v892_v27 = vshrl.u32 %v2003_v56, %v891_v57  ;;  %vm908_vm9 = vcmp.lt.s32.totalorder %v889_v59, 1  ;;  %vm575_vm10 = vcmp.gt.s32.totalorder %v574_v1, 0  ;;  %vm909_vm11 = vcmp.lt.s32.totalorder %v889_v59, 2 }
  0xf5   : > { %v736_v39 = vclz %v1605_v24  ;;  %v907_v43 = vor.u32 %v906_v44, %v905_v9  ;;  %vm911_vm12 = vcmp.lt.s32.totalorder %v889_v59, 4  ;;  %vm910_vm13 = vcmp.lt.s32.totalorder %v889_v59, 3 }
  0xf6   : > { %v913_v40 = vsel %vm911_vm12, %v901_v13, 2102212464  ;;  %v916_v34 = vsel %vm908_vm9, %v895_v12, %v898_v46  ;;  %v917_v52 = vsel %vm911_vm12, %v904_v25, 920167782  ;;  %v912_v0 = vsel %vm908_vm9, %v892_v27, %v895_v12 }
  0xf7   : > { %v1606_v51 = vadd.s32 4294967294, %v736_v39  ;;  %v918_v31 = vsel %vm910_vm13, %v901_v13, %v917_v52  ;;  %v920_v38 = vsel %vm908_vm9, %v898_v46, %v901_v13  ;;  %v914_v32 = vsel %vm910_vm13, %v898_v46, %v913_v40 }
  0xf8   : > { %v919_v19 = vsel %vm909_vm11, %v916_v34, %v918_v31  ;;  %v921_v15 = vsel %vm911_vm12, %v907_v43, 1326507024  ;;  %v576_v57 = vsel %vm575_vm10, %v574_v1, 0  ;;  %v544_v14 = vxor.u32 2147483648, %v543_v48 }
  0xf9   : > { %vm1607_vm14 = vcmp.lt.s32.totalorder %v1606_v51, 0  ;;  %v922_v6 = vsel %vm910_vm13, %v904_v25, %v921_v15  ;;  %v2426_v2 = vmul.u32.u64.low %v2402_v30, %v919_v19  ;;  %v2427_v8 = vmul.u32.u64.high %v2402_v30, %v919_v19, %v2426_v2 }
  0xfa   : > { %v739_v10 = vsel %vm1607_vm14, 0, %v1606_v51  ;;  %v923_v54 = vsel %vm909_vm11, %v920_v38, %v922_v6  ;;  %v2431_v11 = vshrl.u32 %v576_v57, 5  ;;  %v915_v13 = vsel %vm909_vm11, %v912_v0, %v914_v32 }
  0xfb   : > { %v740_v12 = vsub.s32 32, %v739_v10  ;;  %v744_v46 = vsub.s32 4294967266, %v739_v10  ;;  %v578_v24 = vand.u32 31, %v576_v57  ;;  %v741_v1 = vshll.u32 %v2406_v4, %v739_v10 }
  0xfc   : > { %v754_v25 = vsub.s32 4, %v2384_v28  ;;  %v2437_v9 = vmul.u32.u64.low %v2402_v30, %v923_v54  ;;  %v2438_v44 = vmul.u32.u64.high %v2402_v30, %v923_v54, %v2437_v9  ;;  %v934_v43 = vadd.s32 1, %v2427_v8 }
  0xfd   : > { %v742_v27 = vshrl.u32 %v2395_v50, %v740_v12  ;;  %v745_v39 = vadd.s32 127, %v744_v46  ;;  %v579_v40 = vsub.s32 32, %v578_v24  ;;  %v545_v34 = vsel %vm462_vm4, %v544_v14, %v543_v48 }
  0xfe   : > { %v931_v59 = vmul.u32 %v2402_v30, %v915_v13  ;;  %v581_v52 = vshll.u32 %v2003_v56, %v578_v24  ;;  %vm596_vm15 = vcmp.lt.s32.totalorder %v2431_v11, 1  ;;  %v584_v31 = vshll.u32 %v2004_v58, %v578_v24 }
  0xff   : > { %v743_v4 = vor.u32 %v742_v27, %v741_v1  ;;  %v746_v51 = vshll.u32 %v745_v39, 23  ;;  %v582_v0 = vshrl.u32 %v2004_v58, %v579_v40  ;;  %vm933_vm0 = vc.u32 %v2438_v44, %v2426_v2 }
 0x100   : > { %v585_v50 = vshrl.u32 %v2005_v60, %v579_v40  ;;  %v587_v38 = vshll.u32 %v2005_v60, %v578_v24  ;;  %v588_v48 = vshrl.u32 %v2006_v62, %v579_v40  ;;  %v935_v32 = vsel %vm933_vm0, %v934_v43, %v2427_v8 }
 0x101   : > { %v747_v30 = vor.u32 4788187, %v746_v51  ;;  %v583_v19 = vor.u32 %v582_v0, %v581_v52  ;;  %v590_v15 = vshll.u32 %v2006_v62, %v578_v24  ;;  %vm670_vm1 = vcmp.lt.s32.totalorder %v2168_v55, 0 }
 0x102   : > { %v936_v57 = vadd.s32 %v935_v32, %v931_v59  ;;  %v586_v6 = vor.u32 %v585_v50, %v584_v31  ;;  %v589_v14 = vor.u32 %v588_v48, %v587_v38  ;;  %v591_v10 = vshrl.u32 %v2007_v3, %v579_v40 }
 0x103   : > { %v748_v54 = vand.u32 2147483647, %v747_v30  ;;  %v750_v12 = vcvt.s32.f32 %v743_v4  ;;  %v593_v46 = vshll.u32 %v2007_v3, %v578_v24  ;;  %v594_v13 = vshrl.u32 %v2008_v7, %v579_v40 }
 0x104   : > { %v937_v1 = vadd.s32 536870912, %v936_v57  ;;  %v580_v9 = vshrl.u32 %v2003_v56, %v579_v40  ;;  %v592_v8 = vor.u32 %v591_v10, %v590_v15  ;;  %vm599_vm2 = vcmp.lt.s32.totalorder %v2431_v11, 4 }
 0x105   : > { %vm2464_vm4 = vcmp.le.f32.partialorder %v668_v47, 0.7853982  ;;  %v751_v39 = vmul.f32 %v750_v12, %v748_v54  ;;  %v595_v43 = vor.u32 %v594_v13, %v593_v46  ;;  %v601_v59 = vsel %vm599_vm2, %v589_v14, 2102212464 }
 0x106   : > { %v604_v24 = vsel %vm596_vm15, %v583_v19, %v586_v6  ;;  %v938_v52 = vshrl.u32 %v937_v1, 30  ;;  %vm598_vm5 = vcmp.lt.s32.totalorder %v2431_v11, 3  ;;  %v605_v4 = vsel %vm599_vm2, %v592_v8, 920167782 }
 0x107   : > { %v608_v40 = vsel %vm596_vm15, %v586_v6, %v589_v14  ;;  %vm597_vm6 = vcmp.lt.s32.totalorder %v2431_v11, 2  ;;  %v600_v47 = vsel %vm596_vm15, %v580_v9, %v583_v19  ;;  %v606_v51 = vsel %vm598_vm5, %v589_v14, %v605_v4  ;;  %v342_v9 = vpop.permute.xlu1 %341 }
 0x108   : > { %v609_v0 = vsel %vm599_vm2, %v595_v43, 1326507024  ;;  %v939_v31 = vshll.u32 %v938_v52, 30  ;;  %v602_v50 = vsel %vm598_vm5, %v586_v6, %v601_v59  ;;  %v607_v38 = vsel %vm597_vm6, %v604_v24, %v606_v51 }
 0x109   : > { %v610_v48 = vsel %vm598_vm5, %v592_v8, %v609_v0  ;;  %v752_v30 = vxor.u32 2147483648, %v751_v39  ;;  %v2481_v15 = vmul.u32.u64.low %v2417_v20, %v607_v38  ;;  %v2482_v10 = vmul.u32.u64.high %v2417_v20, %v607_v38, %v2481_v15 }
 0x10a   : > { %v611_v32 = vsel %vm597_vm6, %v608_v40, %v610_v48  ;;  %v2489_v19 = vadd.s32 3, %v445_v41  ;;  %v2495_v6 = vadd.s32 3, %v549_v49  ;;  %vm878_vm8 = vcmp.lt.s32.totalorder %v2300_v63, 0 }
 0x10b   : > { %v2498_v14 = vsub.s32 %v936_v57, %v939_v31  ;;  %1864 = vcosq.f32 %v2389_v35  ;;  %v755_v45 = vsel %vm670_vm1, %v754_v25, %v2384_v28  ;;  %vm2506_vm3 = vcmp.le.f32.partialorder %v876_v42, 0.7853982 }
 0x10c   : > { %v2511_v22 = vmul.u32.u64.low %v2417_v20, %v611_v32  ;;  %v2512_v41 = vmul.u32.u64.high %v2417_v20, %v611_v32, %v2511_v22  ;;  %v548_v49 = vsel %vm2367_vm7, %v2158_v37, %v545_v34  ;;  %v603_v54 = vsel %vm597_vm6, %v600_v47, %v602_v50 }
 0x10d   : > { %v942_v57 = vsub.s32 0, %v2498_v14  ;;  %v772_v28 = vand.u32 2147483647, %v2404_v21  ;;  %v753_v42 = vsel %vm670_vm1, %v752_v30, %v751_v39  ;;  %v962_v25 = vsub.s32 4, %v938_v52  ;;  %v346_v30 = vpop.permute.xlu1 %345 }
 0x10e   : > { %v622_v12 = vadd.s32 1, %v2482_v10  ;;  %v775_v46 = vand.u32 2139095040, %v2404_v21  ;;  %1866 = vsinq.f32 %v2389_v35  ;;  %v757_v29 = vsel %vm2464_vm4, 0, %v755_v45 }
 0x10f   : > { %v1613_v34 = vmin.u32 %v942_v57, %v2498_v14  ;;  %v263_v11 = vmul.f32 %v2140_v18, %v2327_v33  ;;  %1868 = vcosq.f32 %v548_v49  ;;  %v619_v13 = vmul.u32 %v2417_v20, %v603_v54 }
 0x110   : > { %vm621_vm7 = vc.u32 %v2512_v41, %v2481_v15  ;;  %v776_v1 = vshrl.u32 %v775_v46, 23  ;;  %v756_v35 = vsel %vm2464_vm4, %v2168_v55, %v753_v42  ;;  %v314_v43 = vadd.f32 %v2269_v5, %v2399_v61 }
 0x111   : > { %v944_v8 = vclz %v1613_v34  ;;  %v623_v39 = vsel %vm621_vm7, %v622_v12, %v2482_v10  ;;  %v963_v18 = vsel %vm878_vm8, %v962_v25, %v938_v52  ;;  %v779_v59 = vand.u32 8388607, %v772_v28 }
 0x112   : > { %v624_v33 = vadd.s32 %v623_v39, %v619_v13  ;;  %v1608_v20 = vadd.s32 4294967169, %v776_v1  ;;  %1870 = vsinq.f32 %v548_v49  ;;  %v307_v27 = vmul.f32 %v2138_v17, %v2354_v36 }
 0x113   : > { %v1614_v24 = vadd.s32 4294967294, %v944_v8  ;;  %v2546_v4 = vadd.f32 %v342_v9, %v314_v43  ;;  %1872 = vcosq.f32 %v756_v35  ;;  %v2548_v40 = vadd.s32 3, %v757_v29 }
 0x114   : > { %v625_v47 = vadd.s32 536870912, %v624_v33  ;;  %v782_v5 = vadd.s32 1, %v1608_v20  ;;  %1874 = vsinq.f32 %v756_v35  ;;  %v932_v61 = vadd.s32 %v2426_v2, %v2438_v44 }
 0x115   : > { %vm1615_vm9 = vcmp.lt.s32.totalorder %v1614_v24, 0  ;;  %v965_v52 = vsel %vm2506_vm3, 0, %v963_v18  ;;  %v2554_v51 = vpop.eup %1864  ;;  %v780_v17 = vor.u32 8388608, %v779_v59  ;;  %v983_v48 = vand.u32 2139095040, %v2546_v4 }
 0x116   : > { %v947_v0 = vsel %vm1615_vm9, 0, %v1614_v24  ;;  %v2556_v31 = vshrl.u32 %v625_v47, 30  ;;  %vm783_vm10 = vcmp.gt.s32.totalorder %v782_v5, 0  ;;  %v2559_v32 = vadd.s32 3, %v965_v52 }
 0x117   : > { %v948_v36 = vsub.s32 32, %v947_v0  ;;  %v952_v50 = vsub.s32 4294967266, %v947_v0  ;;  %v784_v38 = vsel %vm783_vm10, %v782_v5, 0  ;;  %v315_v10 = vadd.f32 %v307_v27, %v263_v11 }
 0x118   : > { %v627_v2 = vshll.u32 %v2556_v31, 30  ;;  %v786_v44 = vand.u32 31, %v784_v38  ;;  %v2562_v45 = vpop.eup %1866  ;;  %v949_v22 = vshll.u32 %v2498_v14, %v947_v0  ;;  %v2567_v54 = vadd.s32 %v2481_v15, %v2512_v41 }
 0x119   : > { %v950_v49 = vshrl.u32 %v932_v61, %v948_v36  ;;  %v953_v57 = vadd.s32 127, %v952_v50  ;;  %v2569_v42 = vpop.eup %1868  ;;  %v2573_v46 = vshll.u32 %v780_v17, 8  ;;  %v2575_v29 = vadd.f32 %v346_v30, %v315_v10 }
 0x11a   : > { %v2571_v25 = vsub.s32 %v624_v33, %v627_v2  ;;  %v787_v12 = vsub.s32 32, %v786_v44  ;;  %v980_v13 = vand.u32 2147483647, %v2546_v4  ;;  %v984_v14 = vshrl.u32 %v983_v48, 23 }
 0x11b   : > { %v951_v34 = vor.u32 %v950_v49, %v949_v22  ;;  %v954_v11 = vshll.u32 %v953_v57, 23  ;;  %v2579_v9 = vshrl.u32 %v784_v38, 5  ;;  %v789_v15 = vshll.u32 %v2003_v56, %v786_v44 }
 0x11c   : > { %v630_v1 = vsub.s32 0, %v2571_v25  ;;  %v790_v41 = vshrl.u32 %v2004_v58, %v787_v12  ;;  %v2583_v35 = vpop.eup %1870  ;;  %v792_v43 = vshll.u32 %v2004_v58, %v786_v44  ;;  %v793_v18 = vshrl.u32 %v2005_v60, %v787_v12 }
 0x11d   : > { %v955_v8 = vor.u32 4788187, %v954_v11  ;;  %v958_v39 = vcvt.s32.f32 %v951_v34  ;;  %v2587_v33 = vpop.eup %1872  ;;  %v795_v24 = vshll.u32 %v2005_v60, %v786_v44  ;;  %v796_v27 = vshrl.u32 %v2006_v62, %v787_v12 }
 0x11e   : > { %v1601_v20 = vmin.u32 %v630_v1, %v2571_v25  ;;  %v791_v59 = vor.u32 %v790_v41, %v789_v15  ;;  %v2592_v47 = vpop.eup %1874  ;;  %v794_v61 = vor.u32 %v793_v18, %v792_v43  ;;  %v798_v52 = vshll.u32 %v2006_v62, %v786_v44 }
 0x11f   : > { %v956_v5 = vand.u32 2147483647, %v955_v8  ;;  %v799_v0 = vshrl.u32 %v2007_v3, %v787_v12  ;;  %vm566_vm11 = vcmp.lt.s32.totalorder %v2281_v16, 0  ;;  %v797_v36 = vor.u32 %v796_v27, %v795_v24 }
 0x120   : > { %v632_v17 = vclz %v1601_v20  ;;  %v802_v50 = vshrl.u32 %v2008_v7, %v787_v12  ;;  %v2600_v38 = vand.u32 8388607, %v980_v13  ;;  %v650_v30 = vsub.s32 4, %v2556_v31 }
 0x121   : > { %v959_v48 = vmul.f32 %v958_v39, %v956_v5  ;;  %v800_v2 = vor.u32 %v799_v0, %v798_v52  ;;  %v801_v10 = vshll.u32 %v2007_v3, %v786_v44  ;;  %v788_v49 = vshrl.u32 %v2003_v56, %v787_v12 }
 0x122   : > { %v1602_v22 = vadd.s32 4294967294, %v632_v17  ;;  %vm804_vm12 = vcmp.lt.s32.totalorder %v2579_v9, 1  ;;  %vm807_vm13 = vcmp.lt.s32.totalorder %v2579_v9, 4  ;;  %vm806_vm14 = vcmp.lt.s32.totalorder %v2579_v9, 3 }
 0x123   : > { %v803_v57 = vor.u32 %v802_v50, %v801_v10  ;;  %v812_v34 = vsel %vm804_vm12, %v791_v59, %v794_v61  ;;  %v813_v11 = vsel %vm807_vm13, %v800_v2, 920167782  ;;  %vm2614_vm15 = vcmp.le.f32.partialorder %v564_v53, 0.7853982 }
 0x124   : > { %vm1603_vm0 = vcmp.lt.s32.totalorder %v1602_v22, 0  ;;  %vm805_vm1 = vcmp.lt.s32.totalorder %v2579_v9, 2  ;;  %v809_v12 = vsel %vm807_vm13, %v797_v36, 2102212464  ;;  %v814_v1 = vsel %vm806_vm14, %v797_v36, %v813_v11 }
 0x125   : > { %v960_v15 = vxor.u32 2147483648, %v959_v48  ;;  %v635_v41 = vsel %vm1603_vm0, 0, %v1602_v22  ;;  %v815_v8 = vsel %vm805_vm1, %v812_v34, %v814_v1  ;;  %v1616_v39 = vadd.s32 4294967169, %v984_v14 }
 0x126   : > { %v636_v43 = vsub.s32 32, %v635_v41  ;;  %v640_v53 = vsub.s32 4294967266, %v635_v41  ;;  %v808_v18 = vsel %vm804_vm12, %v788_v49, %v791_v59  ;;  %v816_v20 = vsel %vm804_vm12, %v794_v61, %v797_v36 }
 0x127   : > { %v810_v24 = vsel %vm806_vm14, %v794_v61, %v809_v12  ;;  %v817_v27 = vsel %vm807_vm13, %v803_v57, 1326507024  ;;  %v2634_v5 = vmul.u32.u64.low %v2573_v46, %v815_v8  ;;  %v2635_v52 = vmul.u32.u64.high %v2573_v46, %v815_v8, %v2634_v5 }
 0x128   : > { %v637_v14 = vshll.u32 %v2571_v25, %v635_v41  ;;  %v638_v0 = vshrl.u32 %v2567_v54, %v636_v43  ;;  %v641_v17 = vadd.s32 127, %v640_v53  ;;  %v818_v59 = vsel %vm806_vm14, %v800_v2, %v817_v27 }
 0x129   : > { %v961_v36 = vsel %vm878_vm8, %v960_v15, %v959_v48  ;;  %v651_v61 = vsel %vm566_vm11, %v650_v30, %v2556_v31  ;;  %v819_v50 = vsel %vm805_vm1, %v816_v20, %v818_v59  ;;  %v990_v10 = vadd.s32 1, %v1616_v39 }
 0x12a   : > { %v639_v22 = vor.u32 %v638_v0, %v637_v14  ;;  %v642_v49 = vshll.u32 %v641_v17, 23  ;;  %v2650_v25 = vmul.u32.u64.low %v2573_v46, %v819_v50  ;;  %v2651_v54 = vmul.u32.u64.high %v2573_v46, %v819_v50, %v2650_v25 }
 0x12b   : > { %v811_v2 = vsel %vm805_vm1, %v808_v18, %v810_v24  ;;  %v830_v57 = vadd.s32 1, %v2635_v52  ;;  %vm991_vm2 = vcmp.gt.s32.totalorder %v990_v10, 0  ;;  %v2657_v48 = vand.u32 3, %v2489_v19 }
 0x12c   : > { %v964_v31 = vsel %vm2506_vm3, %v2300_v63, %v961_v36  ;;  %v643_v30 = vor.u32 4788187, %v642_v49  ;;  %v992_v34 = vsel %vm991_vm2, %v990_v10, 0  ;;  %v453_v11 = vxor.u32 2147483648, %v2562_v45 }
 0x12d   : > { %v653_v12 = vsel %vm2614_vm15, 0, %v651_v61  ;;  %v988_v9 = vor.u32 8388608, %v2600_v38  ;;  %v994_v1 = vand.u32 31, %v992_v34  ;;  %v1084_v15 = vand.u32 2147483647, %v2575_v29 }
 0x12e   : > { %v644_v41 = vand.u32 2147483647, %v643_v30  ;;  %v646_v8 = vcvt.s32.f32 %v639_v22  ;;  %v827_v19 = vmul.u32 %v2573_v46, %v811_v2  ;;  %vm829_vm4 = vc.u32 %v2651_v54, %v2634_v5 }
 0x12f   : > { %1876 = vcosq.f32 %v964_v31  ;;  %v831_v23 = vsel %vm829_vm4, %v830_v57, %v2635_v52  ;;  %v995_v39 = vsub.s32 32, %v994_v1  ;;  %v1087_v43 = vand.u32 2139095040, %v2575_v29 }
 0x130   : > { %v647_v53 = vmul.f32 %v646_v8, %v644_v41  ;;  %v832_v18 = vadd.s32 %v831_v23, %v827_v19  ;;  %v993_v20 = vshrl.u32 %v992_v34, 5  ;;  %v997_v38 = vshll.u32 %v2003_v56, %v994_v1 }
 0x131   : > { %v998_v24 = vshrl.u32 %v2004_v58, %v995_v39  ;;  %v1000_v27 = vshll.u32 %v2004_v58, %v994_v1  ;;  %v1001_v46 = vshrl.u32 %v2005_v60, %v995_v39  ;;  %v1004_v14 = vshrl.u32 %v2006_v62, %v995_v39 }
 0x132   : > { %v833_v0 = vadd.s32 536870912, %v832_v18  ;;  %v1003_v17 = vshll.u32 %v2005_v60, %v994_v1  ;;  %v1006_v52 = vshll.u32 %v2006_v62, %v994_v1  ;;  %v1007_v59 = vshrl.u32 %v2007_v3, %v995_v39 }
 0x133   : > { %v648_v36 = vxor.u32 2147483648, %v647_v53  ;;  %v999_v61 = vor.u32 %v998_v24, %v997_v38  ;;  %v1002_v50 = vor.u32 %v1001_v46, %v1000_v27  ;;  %v1010_v10 = vshrl.u32 %v2008_v7, %v995_v39 }
 0x134   : > { %vm774_vm5 = vcmp.lt.s32.totalorder %v2404_v21, 0  ;;  %v834_v22 = vshrl.u32 %v833_v0, 30  ;;  %v1005_v49 = vor.u32 %v1004_v14, %v1003_v17  ;;  %v1008_v25 = vor.u32 %v1007_v59, %v1006_v52 }
 0x135   : > { %v1009_v2 = vshll.u32 %v2007_v3, %v994_v1  ;;  %1878 = vsinq.f32 %v964_v31  ;;  %v2683_v57 = vadd.s32 3, %v653_v12  ;;  %v1028_v30 = vshll.u32 %v988_v9, 8 }
 0x136   : > { %v1091_v34 = vand.u32 8388607, %v1084_v15  ;;  %v835_v41 = vshll.u32 %v834_v22, 30  ;;  %vm1012_vm6 = vcmp.lt.s32.totalorder %v993_v20, 1  ;;  %v1088_v19 = vshrl.u32 %v1087_v43, 23 }
 0x137   : > { %v1011_v8 = vor.u32 %v1010_v10, %v1009_v2  ;;  %v649_v23 = vsel %vm566_vm11, %v648_v36, %v647_v53  ;;  %vm2691_vm8 = vcmp.le.f32.partialorder %v772_v28, 0.7853982  ;;  %v996_v31 = vshrl.u32 %v2003_v56, %v995_v39 }
 0x138   : > { %vm1015_vm3 = vcmp.lt.s32.totalorder %v993_v20, 4  ;;  %v1020_v12 = vsel %vm1012_vm6, %v999_v61, %v1002_v50  ;;  %v2697_v9 = vsub.s32 %v832_v18, %v835_v41  ;;  %vm1014_vm7 = vcmp.lt.s32.totalorder %v993_v20, 3 }
 0x139   : > { %v1017_v1 = vsel %vm1015_vm3, %v1005_v49, 2102212464  ;;  %v1021_v24 = vsel %vm1015_vm3, %v1008_v25, 920167782  ;;  %v2699_v43 = vpop.eup %1876  ;;  %v858_v27 = vsub.s32 4, %v834_v22  ;;  %vm1013_vm9 = vcmp.lt.s32.totalorder %v993_v20, 2 }
 0x13a   : > { %v1022_v53 = vsel %vm1014_vm7, %v1005_v49, %v1021_v24  ;;  %v1024_v28 = vsel %vm1012_vm6, %v1002_v50, %v1005_v49  ;;  %v838_v46 = vsub.s32 0, %v2697_v9  ;;  %v1016_v14 = vsel %vm1012_vm6, %v996_v31, %v999_v61 }
 0x13b   : > { %v1023_v39 = vsel %vm1013_vm9, %v1020_v12, %v1022_v53  ;;  %v1025_v0 = vsel %vm1015_vm3, %v1011_v8, 1326507024  ;;  %v1018_v17 = vsel %vm1014_vm7, %v1002_v50, %v1017_v1  ;;  %v652_v36 = vsel %vm2614_vm15, %v2281_v16, %v649_v23 }
 0x13c   : > { %v1026_v18 = vsel %vm1014_vm7, %v1008_v25, %v1025_v0  ;;  %v2705_v52 = vmul.u32.u64.low %v1028_v30, %v1023_v39  ;;  %v2706_v59 = vmul.u32.u64.high %v1028_v30, %v1023_v39, %v2705_v52  ;;  %v1609_v10 = vmin.u32 %v838_v46, %v2697_v9 }
 0x13d   : > { %v1027_v49 = vsel %vm1013_vm9, %v1024_v28, %v1026_v18  ;;  %v1620_v2 = vadd.s32 4294967169, %v1088_v19  ;;  %v2716_v61 = vsel %vm774_vm5, %v858_v27, %v834_v22  ;;  %vm452_vm10 = vcmp.eq.s32.totalorder %v2657_v48, 0 }
 0x13e   : > { %v2718_v41 = vmul.u32.u64.low %v1028_v30, %v1027_v49  ;;  %v2719_v50 = vmul.u32.u64.high %v1028_v30, %v1027_v49, %v2718_v41  ;;  %v840_v25 = vclz %v1609_v10  ;;  %v1019_v8 = vsel %vm1013_vm9, %v1016_v14, %v1018_v17 }
 0x13f   : > { %v1092_v31 = vor.u32 8388608, %v1091_v34  ;;  %v1094_v44 = vadd.s32 1, %v1620_v2  ;;  %v2723_v23 = vpop.eup %1878  ;;  %1880 = vcosq.f32 %v652_v36  ;;  %v828_v19 = vadd.s32 %v2634_v5, %v2651_v54 }
 0x140   : > { %v1038_v12 = vadd.s32 1, %v2706_v59  ;;  %v454_v22 = vsel %vm452_vm10, %v2554_v51, %v453_v11  ;;  %1882 = vsinq.f32 %v652_v36  ;;  %v1610_v1 = vadd.s32 4294967294, %v840_v25 }
 0x141   : > { %v861_v20 = vsel %vm2691_vm8, 0, %v2716_v61  ;;  %vm1095_vm11 = vcmp.gt.s32.totalorder %v1094_v44, 0  ;;  %vm451_vm12 = vcmp.lt.s32.totalorder %v2657_v48, 2  ;;  %v1035_v34 = vmul.u32 %v1028_v30, %v1019_v8 }
 0x142   : > { %vm1037_vm13 = vc.u32 %v2719_v50, %v2705_v52  ;;  %v1096_v5 = vsel %vm1095_vm11, %v1094_v44, 0  ;;  %v456_v54 = vxor.u32 2147483648, %v2554_v51  ;;  %vm1611_vm14 = vcmp.lt.s32.totalorder %v1610_v1, 0 }
 0x143   : > { %v1039_v24 = vsel %vm1037_vm13, %v1038_v12, %v2706_v59  ;;  %v1098_v11 = vand.u32 31, %v1096_v5  ;;  %v2739_v27 = vshll.u32 %v1092_v31, 8  ;;  %v843_v53 = vsel %vm1611_vm14, 0, %v1610_v1 }
 0x144   : > { %v1040_v28 = vadd.s32 %v1039_v24, %v1035_v34  ;;  %vm455_vm15 = vcmp.eq.s32.totalorder %v2657_v48, 2  ;;  %v2743_v46 = vand.u32 3, %v2495_v6  ;;  %v844_v30 = vsub.s32 32, %v843_v53 }
 0x145   : > { %v848_v14 = vsub.s32 4294967266, %v843_v53  ;;  %v1099_v39 = vsub.s32 32, %v1098_v11  ;;  %v557_v0 = vxor.u32 2147483648, %v2583_v35  ;;  %v845_v51 = vshll.u32 %v2697_v9, %v843_v53 }
 0x146   : > { %v1041_v17 = vadd.s32 536870912, %v1040_v28  ;;  %v457_v18 = vsel %vm455_vm15, %v456_v54, %v2562_v45  ;;  %v560_v59 = vxor.u32 2147483648, %v2569_v42  ;;  %v846_v36 = vshrl.u32 %v828_v19, %v844_v30 }
 0x147   : > { %v849_v10 = vadd.s32 127, %v848_v14  ;;  %v1101_v49 = vshll.u32 %v2003_v56, %v1098_v11  ;;  %v1102_v2 = vshrl.u32 %v2004_v58, %v1099_v39  ;;  %v1104_v41 = vshll.u32 %v2004_v58, %v1098_v11 }
 0x148   : > { %v2751_v6 = vshrl.u32 %v1041_v17, 30  ;;  %v1105_v25 = vshrl.u32 %v2005_v60, %v1099_v39  ;;  %v1108_v8 = vshrl.u32 %v2006_v62, %v1099_v39  ;;  %v847_v9 = vor.u32 %v846_v36, %v845_v51 }
 0x149   : > { %v850_v31 = vshll.u32 %v849_v10, 23  ;;  %v1107_v45 = vshll.u32 %v2005_v60, %v1098_v11  ;;  %v1111_v44 = vshrl.u32 %v2007_v3, %v1099_v39  ;;  %v2758_v19 = vpop.eup %1880  ;;  %v1097_v1 = vshrl.u32 %v1096_v5, 5 }
 0x14a   : > { %v1043_v12 = vshll.u32 %v2751_v6, 30  ;;  %v1110_v34 = vshll.u32 %v2006_v62, %v1098_v11  ;;  %v458_v58 = vsel %vm451_vm12, %v454_v22, %v457_v18  ;;  %v2764_v54 = vpop.eup %1882  ;;  %v1103_v53 = vor.u32 %v1102_v2, %v1101_v49 }
 0x14b   : > { %v851_v24 = vor.u32 4788187, %v850_v31  ;;  %v1106_v30 = vor.u32 %v1105_v25, %v1104_v41  ;;  %v1109_v14 = vor.u32 %v1108_v8, %v1107_v45  ;;  %v1113_v17 = vshll.u32 %v2007_v3, %v1098_v11 }
 0x14c   : > { %v2766_v51 = vsub.s32 %v1040_v28, %v1043_v12  ;;  %v1112_v60 = vor.u32 %v1111_v44, %v1110_v34  ;;  %v1114_v36 = vshrl.u32 %v2008_v7, %v1099_v39  ;;  %vm556_vm0 = vcmp.eq.s32.totalorder %v2743_v46, 0 }
 0x14d   : > { %v852_v5 = vand.u32 2147483647, %v851_v24  ;;  %v854_v62 = vcvt.s32.f32 %v847_v9  ;;  %v1100_v48 = vshrl.u32 %v2003_v56, %v1099_v39  ;;  %vm555_vm1 = vcmp.lt.s32.totalorder %v2743_v46, 2 }
 0x14e   : > { %vm559_vm2 = vcmp.eq.s32.totalorder %v2743_v46, 2  ;;  %v1046_v22 = vsub.s32 0, %v2766_v51  ;;  %v1115_v18 = vor.u32 %v1114_v36, %v1113_v17  ;;  %vm1116_vm4 = vcmp.lt.s32.totalorder %v1097_v1, 1 }
 0x14f   : > { %vm1119_vm6 = vcmp.lt.s32.totalorder %v1097_v1, 4  ;;  %vm552_vm3 = vweird.f32 %v2158_v37  ;;  %v855_v3 = vmul.f32 %v854_v62, %v852_v5  ;;  %vm1117_vm7 = vcmp.lt.s32.totalorder %v1097_v1, 2 }
 0x150   : > { %v1121_v7 = vsel %vm1119_vm6, %v1109_v14, 2102212464  ;;  %v1124_v11 = vsel %vm1116_vm4, %v1103_v53, %v1106_v30  ;;  %vm448_vm9 = vweird.f32 %v2148_v26  ;;  %v1617_v28 = vmin.u32 %v1046_v22, %v2766_v51 }
 0x151   : > { %vm1118_vm10 = vcmp.lt.s32.totalorder %v1097_v1, 3  ;;  %v1125_v56 = vsel %vm1119_vm6, %v1112_v60, 920167782  ;;  %v1128_v39 = vsel %vm1116_vm4, %v1106_v30, %v1109_v14  ;;  %v856_v10 = vxor.u32 2147483648, %v855_v3 }
 0x152   : > { %v1120_v49 = vsel %vm1116_vm4, %v1100_v48, %v1103_v53  ;;  %v1126_v2 = vsel %vm1118_vm10, %v1109_v14, %v1125_v56  ;;  %v1129_v41 = vsel %vm1119_vm6, %v1115_v18, 1326507024  ;;  %v1048_v25 = vclz %v1617_v28 }
 0x153   : > { %v1122_v8 = vsel %vm1118_vm10, %v1106_v30, %v1121_v7  ;;  %v1127_v9 = vsel %vm1117_vm7, %v1124_v11, %v1126_v2  ;;  %v1130_v31 = vsel %vm1118_vm10, %v1112_v60, %v1129_v41  ;;  %v857_v45 = vsel %vm774_vm5, %v856_v10, %v855_v3 }
 0x154   : > { %v1131_v44 = vsel %vm1117_vm7, %v1128_v39, %v1130_v31  ;;  %v2783_v12 = vmul.u32.u64.low %v2739_v27, %v1127_v9  ;;  %v2784_v34 = vmul.u32.u64.high %v2739_v27, %v1127_v9, %v2783_v12  ;;  %v860_v24 = vsel %vm2691_vm8, %v2404_v21, %v857_v45 }
 0x155   : > { %v1618_v53 = vadd.s32 4294967294, %v1048_v25  ;;  %v2791_v30 = vmul.u32.u64.low %v2739_v27, %v1131_v44  ;;  %v2792_v14 = vmul.u32.u64.high %v2739_v27, %v1131_v44, %v2791_v30  ;;  %1884 = vcosq.f32 %v860_v24 }
 0x156   : > { %v1123_v60 = vsel %vm1117_vm7, %v1120_v49, %v1122_v8  ;;  %v558_v17 = vsel %vm556_vm0, %v2569_v42, %v557_v0  ;;  %v561_v36 = vsel %vm559_vm2, %v560_v59, %v2583_v35  ;;  %1886 = vsinq.f32 %v860_v24 }
 0x157   : > { %vm1619_vm5 = vcmp.lt.s32.totalorder %v1618_v53, 0  ;;  %v562_v5 = vsel %vm555_vm1, %v558_v17, %v561_v36  ;;  %v658_v1 = vand.u32 3, %v2683_v57  ;;  %v1142_v48 = vadd.s32 1, %v2784_v34 }
 0x158   : > { %v1051_v62 = vsel %vm1619_vm5, 0, %v1618_v53  ;;  %v563_v22 = vsel %vm552_vm3, nan, %v562_v5  ;;  %v661_v0 = vxor.u32 2147483648, %v2764_v54  ;;  %v865_v42 = vadd.s32 3, %v861_v20 }
 0x159   : > { %v1056_v35 = vsub.s32 4294967266, %v1051_v62  ;;  %v459_v46 = vsel %vm448_vm9, nan, %v458_v58  ;;  %vm656_vm11 = vweird.f32 %v2281_v16  ;;  %v1036_v57 = vadd.s32 %v2705_v52, %v2719_v50 }
 0x15a   : > { %v1139_v59 = vmul.u32 %v2739_v27, %v1123_v60  ;;  %vm1141_vm12 = vc.u32 %v2792_v14, %v2783_v12  ;;  %v1709_v37 = vpack.c.bf16 %v563_v22, %v459_v46  ;;  %v1052_v18 = vsub.s32 32, %v1051_v62 }
 0x15b   : > { %v1057_v38 = vadd.s32 127, %v1056_v35  ;;  %v1143_v61 = vsel %vm1141_vm12, %v1142_v48, %v2784_v34  ;;  %vm660_vm8 = vcmp.eq.s32.totalorder %v658_v1, 0  ;;  %v664_v58 = vxor.u32 2147483648, %v2758_v19 }
 0x15c   : > { %v1144_v20 = vadd.s32 %v1143_v61, %v1139_v59  ;;  %1710 = vmatprep.subr.bf16.mxu0 %v1709_v37  ;;  %1725 = vmatprep.subr.bf16.mxu1 %v1709_v37  ;;  %v662_v26 = vsel %vm660_vm8, %v2758_v19, %v661_v0  ;;  %v762_v52 = vand.u32 3, %v2548_v40  ;;  %vm663_vm13 = vcmp.eq.s32.totalorder %v658_v1, 2  ;;  %v1188_v0 = vld [vmem:[%s3082_s2] sm:$0xff] }
 0x15d   : > { %v1058_v50 = vshll.u32 %v1057_v38, 23  ;;  %1712 = vmatpush3.bf16.msra.mxu0 %v1709_v37  ;;  %1729 = vmatpush3.bf16.msra.mxu1 %v1709_v37  ;;  %v765_v27 = vxor.u32 2147483648, %v2592_v47  ;;  %v768_v3 = vxor.u32 2147483648, %v2587_v33  ;;  %vm659_vm14 = vcmp.lt.s32.totalorder %v658_v1, 2  ;;  %v1896_v38 = vld [vmem:[%s3081_s1 + $0x8] sm:$0xff]  ;;  %v1897_v61 = vld [vmem:[%s3081_s1] sm:$0xff] }
 0x15e   : > { %v1145_v7 = vadd.s32 536870912, %v1144_v20  ;;  %v665_v11 = vsel %vm663_vm13, %v664_v58, %v2764_v54  ;;  %vm764_vm15 = vcmp.eq.s32.totalorder %v762_v52, 0  ;;  %v1053_v28 = vshll.u32 %v2766_v51, %v1051_v62  ;;  %v1202_v58 = vld [vmem:[%s3082_s2 + $0x70] sm:$0xff] }
 0x15f   : > { %v1054_v56 = vshrl.u32 %v1036_v57, %v1052_v18  ;;  %v666_v39 = vsel %vm659_vm14, %v662_v26, %v665_v11  ;;  %v766_v19 = vsel %vm764_vm15, %v2587_v33, %v765_v27  ;;  %v1885_v40 = vpop.eup %1884  ;;  %vm760_vm0 = vweird.f32 %v2168_v55 }
 0x160   : > { %v2833_v10 = vshrl.u32 %v1145_v7, 30  ;;  %vm763_vm1 = vcmp.lt.s32.totalorder %v762_v52, 2  ;;  %vm767_vm2 = vcmp.eq.s32.totalorder %v762_v52, 2  ;;  %v1887_v49 = vpop.eup %1886  ;;  %v1059_v2 = vor.u32 4788187, %v1058_v50  ;;  %v1899_v7 = vld [vmem:[%s3081_s1 + $0x18] sm:$0xff] }
 0x161   : > { %v667_v41 = vsel %vm656_vm11, nan, %v666_v39  ;;  %v769_v54 = vsel %vm767_vm2, %v768_v3, %v2592_v47  ;;  %v866_v25 = vand.u32 3, %v865_v42  ;;  %v869_v9 = vxor.u32 2147483648, %v1887_v49  ;;  %v1196_v42 = vld [vmem:[%s3082_s2 + $0x40] sm:$0xff]  ;;  %v1898_v3 = vld [vmem:[%s3081_s1 + $0x10] sm:$0xff] }
 0x162   : > { %v1147_v51 = vshll.u32 %v2833_v10, 30  ;;  %v770_v8 = vsel %vm763_vm1, %v766_v19, %v769_v54  ;;  %v872_v33 = vxor.u32 2147483648, %v1885_v40  ;;  %v1055_v31 = vor.u32 %v1054_v56, %v1053_v28  ;;  %v1900_v39 = vld [vmem:[%s3081_s1 + $0x20] sm:$0xff]  ;;  %v1901_v19 = vld [vmem:[%s3081_s1 + $0x28] sm:$0xff]  ;;  %v1902_v54 = vld [vmem:[%s3081_s1 + $0x30] sm:$0xff] }
 0x163   : > { %v771_v45 = vsel %vm760_vm0, nan, %v770_v8  ;;  %vm868_vm4 = vcmp.eq.s32.totalorder %v866_v25, 0  ;;  %v1060_v24 = vand.u32 2147483647, %v1059_v2  ;;  %vm871_vm6 = vcmp.eq.s32.totalorder %v866_v25, 2 }
 0x164   : > { %v1148_v44 = vsub.s32 %v1144_v20, %v1147_v51  ;;  %v1713_v55 = vpack.c.bf16 %v771_v45, %v667_v41  ;;  %v870_v34 = vsel %vm868_vm4, %v1885_v40, %v869_v9  ;;  %vm867_vm3 = vcmp.lt.s32.totalorder %v866_v25, 2  ;;  %v1903_v25 = vld [vmem:[%s3081_s1 + $0x38] sm:$0xff] }
 0x165   : > { %v873_v16 = vsel %vm871_vm6, %v872_v33, %v1887_v49  ;;  %v970_v47 = vand.u32 3, %v2559_v32  ;;  %v1062_v30 = vcvt.s32.f32 %v1055_v31  ;;  %v973_v17 = vxor.u32 2147483648, %v2723_v23  ;;  %v204_v33 = vld [vmem:[%s3081_s1 + $0x40] sm:$0xff]  ;;  %v205_v31 = vld [vmem:[%s3081_s1 + $0x48] sm:$0xff] }
 0x166   : > { %v1150_v53 = vsub.s32 0, %v1148_v44  ;;  %1714 = vmatprep.subr.bf16.mxu0 %v1713_v55  ;;  %1726 = vmatprep.subr.bf16.mxu1 %v1713_v55  ;;  %v874_v60 = vsel %vm867_vm3, %v870_v34, %v873_v16  ;;  %v976_v36 = vxor.u32 2147483648, %v2699_v43  ;;  %vm864_vm7 = vweird.f32 %v2404_v21  ;;  %v207_v34 = vld [vmem:[%s3081_s1 + $0x58] sm:$0xff] }
 0x167   : > { %1716 = vmatpush3.bf16.msra.mxu0 %v1713_v55  ;;  %1730 = vmatpush3.bf16.msra.mxu1 %v1713_v55  ;;  %v1063_v1 = vmul.f32 %v1062_v30, %v1060_v24  ;;  %v875_v62 = vsel %vm864_vm7, nan, %v874_v60  ;;  %vm972_vm9 = vcmp.eq.s32.totalorder %v970_v47, 0  ;;  %vm975_vm10 = vcmp.eq.s32.totalorder %v970_v47, 2  ;;  %v206_v55 = vld [vmem:[%s3081_s1 + $0x50] sm:$0xff]  ;;  %v208_v60 = vld [vmem:[%s3081_s1 + $0x60] sm:$0xff] }
 0x168   : > { %v1621_v5 = vmin.u32 %v1150_v53, %v1148_v44  ;;  %vm971_vm5 = vcmp.lt.s32.totalorder %v970_v47, 2  ;;  %v974_v22 = vsel %vm972_vm9, %v2699_v43, %v973_v17  ;;  %v977_v32 = vsel %vm975_vm10, %v976_v36, %v2723_v23  ;;  %v209_v17 = vld [vmem:[%s3081_s1 + $0x68] sm:$0xff] }
 0x169   : > { %vm968_vm11 = vweird.f32 %v2300_v63  ;;  %v978_v21 = vsel %vm971_vm5, %v974_v22, %v977_v32  ;;  %vm1276_vm12 = vcmask 523264   ;;  %v1064_v43 = vxor.u32 2147483648, %v1063_v1  ;;  %v211_v22 = vld [vmem:[%s3081_s1 + $0x78] sm:$0xff] }
 0x16a   : > { %v1152_v48 = vclz %v1621_v5  ;;  %v979_v46 = vsel %vm968_vm11, nan, %v978_v21  ;;  %1685 = vmatprep.mubr.msk.f32.mxu0 %vm1276_vm12, %v1188_v0  ;;  %1697 = vmatprep.mubr.msk.f32.mxu1 %vm1276_vm12, %v1196_v42  ;;  %v2009_v23 = vmov 3   ;;  %v1140_v63 = vadd.s32 %v2783_v12, %v2792_v14 }
 0x16b   : > { %v1717_v57 = vpack.c.bf16 %v979_v46, %v875_v62  ;;  %1863 = vset.pattern.permute.xlu1 %v2009_v23  ;;  %1862 = vset.pattern.permute.xlu0 %v2009_v23  ;;  %vm982_vm13 = vcmp.lt.s32.totalorder %v2546_v4, 0  ;;  %vm2868_vm14 = vcmp.le.f32.partialorder %v980_v13, 0.7853982  ;;  %v1066_v11 = vsub.s32 4, %v2751_v6 }
 0x16c   : > { %v1622_v35 = vadd.s32 4294967294, %v1152_v48  ;;  %1209 = vperm.xlu1 %1863, %v1896_v38   ;;  %1205 = vperm.xlu0 %1862, %v1897_v61   ;;  %v1065_v20 = vsel %vm982_vm13, %v1064_v43, %v1063_v1  ;;  %v1170_v49 = vsub.s32 4, %v2833_v10  ;;  %vm1086_vm15 = vcmp.lt.s32.totalorder %v2575_v29, 0  ;;  %v210_v48 = vld [vmem:[%s3081_s1 + $0x70] sm:$0xff]  ;;  %v1199_v38 = vld [vmem:[%s3082_s2 + $0x58] sm:$0xff]  ;;  %v1192_v61 = vld [vmem:[%s3082_s2 + $0x20] sm:$0xff] }
 0x16d   : > { %1718 = vmatprep.subr.bf16.mxu0 %v1717_v57  ;;  %1727 = vmatprep.subr.bf16.mxu1 %v1717_v57  ;;  %v1068_v27 = vsel %vm2868_vm14, %v2546_v4, %v1065_v20  ;;  %v1067_v2 = vsel %vm982_vm13, %v1066_v11, %v2751_v6  ;;  %vm2903_vm0 = vcmp.le.f32.partialorder %v1084_v15, 0.7853982  ;;  %vm1072_vm9 = vweird.f32 %v2546_v4  ;;  %v1190_v4 = vld [vmem:[%s3082_s2 + $0x10] sm:$0xff]  ;;  %v1200_v20 = vld [vmem:[%s3082_s2 + $0x60] sm:$0xff] }
 0x16e   : > { %vm1623_vm8 = vcmp.lt.s32.totalorder %v1622_v35, 0  ;;  %1720 = vmatpush3.bf16.msra.mxu0 %v1717_v57  ;;  %1731 = vmatpush3.bf16.msra.mxu1 %v1717_v57  ;;  %1888 = vcosq.f32 %v1068_v27  ;;  %v1069_v51 = vsel %vm2868_vm14, 0, %v1067_v2  ;;  %v1171_v9 = vsel %vm1086_vm15, %v1170_v49, %v2833_v10 }
 0x16f   : > { %v1155_v59 = vsel %vm1623_vm8, 0, %v1622_v35  ;;  %1890 = vsinq.f32 %v1068_v27  ;;  %v1073_v15 = vadd.s32 3, %v1069_v51  ;;  %vm1176_vm10 = vweird.f32 %v2575_v29 }
 0x170   : > { %v1156_v37 = vsub.s32 32, %v1155_v59  ;;  %v1160_v18 = vsub.s32 4294967266, %v1155_v59  ;;  %v1157_v12 = vshll.u32 %v1148_v44, %v1155_v59  ;;  %1213 = vperm.xlu1 %1863, %v1898_v3   ;;  %1217 = vperm.xlu0 %1862, %v1899_v7   ;;  %v1173_v44 = vsel %vm2903_vm0, 0, %v1171_v9 }
 0x171   : > { %v1177_v53 = vadd.s32 3, %v1173_v44  ;;  %v1074_v16 = vand.u32 3, %v1073_v15 }
 0x172   : > { %v1158_v14 = vshrl.u32 %v1140_v63, %v1156_v37  ;;  %v1161_v26 = vadd.s32 127, %v1160_v18  ;;  %v1189_v63 = vld [vmem:[%s3082_s2 + $0x8] sm:$0xff]  ;;  %v1191_v18 = vld [vmem:[%s3082_s2 + $0x18] sm:$0xff] }
 0x173   : > { %v1178_v36 = vand.u32 3, %v1177_v53  ;;  %vm1076_vm1 = vcmp.eq.s32.totalorder %v1074_v16, 0  ;;  %vm1079_vm2 = vcmp.eq.s32.totalorder %v1074_v16, 2  ;;  %vm1075_vm4 = vcmp.lt.s32.totalorder %v1074_v16, 2  ;;  %v1197_v37 = vld [vmem:[%s3082_s2 + $0x48] sm:$0xff] }
 0x174   : > { %v1159_v52 = vor.u32 %v1158_v14, %v1157_v12  ;;  %v1162_v50 = vshll.u32 %v1161_v26, 23  ;;  %1221 = vperm.xlu1 %1863, %v1900_v39   ;;  %1225 = vperm.xlu0 %1862, %v1901_v19   ;;  %v1193_v12 = vld [vmem:[%s3082_s2 + $0x28] sm:$0xff]  ;;  %v1194_v26 = vld [vmem:[%s3082_s2 + $0x30] sm:$0xff] }
 0x175   : > { %vm1183_vm6 = vcmp.eq.s32.totalorder %v1178_v36, 2  ;;  %vm1180_vm3 = vcmp.eq.s32.totalorder %v1178_v36, 0  ;;  %vm1179_vm7 = vcmp.lt.s32.totalorder %v1178_v36, 2  ;;  %v1201_v14 = vld [vmem:[%s3082_s2 + $0x68] sm:$0xff] }
 0x176   : > { %v1163_v13 = vor.u32 4788187, %v1162_v50  ;;  %v1166_v56 = vcvt.s32.f32 %v1159_v52  ;;  %v1195_v52 = vld [vmem:[%s3082_s2 + $0x38] sm:$0xff] }
 0x177   : > { %v1203_v50 = vld [vmem:[%s3082_s2 + $0x78] sm:$0xff] }
 0x178   : > { %v1164_v28 = vand.u32 2147483647, %v1163_v13  ;;  %1229 = vperm.xlu1 %1863, %v1902_v54   ;;  %1233 = vperm.xlu0 %1862, %v1903_v25   ;;  %v1889_v10 = vpop.eup %1888 }
 0x179   : > { %v1891_v24 = vpop.eup %1890  ;;  %v1080_v30 = vxor.u32 2147483648, %v1889_v10 }
 0x17a   : > { %v1167_v40 = vmul.f32 %v1166_v56, %v1164_v28  ;;  %v1077_v47 = vxor.u32 2147483648, %v1891_v24 }
 0x17b   : > { %v1081_v62 = vsel %vm1079_vm2, %v1080_v30, %v1891_v24 }
 0x17c   : > { %v1168_v41 = vxor.u32 2147483648, %v1167_v40  ;;  %1238 = vperm.xlu1 %1863, %v204_v33   ;;  %1243 = vperm.xlu0 %1862, %v205_v31   ;;  %v1078_v1 = vsel %vm1076_vm1, %v1889_v10, %v1077_v47 }
 0x17d   : > { %v1082_v21 = vsel %vm1075_vm4, %v1078_v1, %v1081_v62 }
 0x17e   : > { %v1169_v8 = vsel %vm1086_vm15, %v1168_v41, %v1167_v40  ;;  %v1083_v43 = vsel %vm1072_vm9, nan, %v1082_v21 }
 0x17f   : > { %v1172_v45 = vsel %vm2903_vm0, %v2575_v29, %v1169_v8  ;;  %v1198_v29 = vld [vmem:[%s3082_s2 + $0x50] sm:$0xff] }
 0x180   : > { %1892 = vcosq.f32 %v1172_v45  ;;  %1248 = vperm.xlu1 %1863, %v206_v55   ;;  %1253 = vperm.xlu0 %1862, %v207_v34  }
 0x181   : > { %1894 = vsinq.f32 %v1172_v45 }
 0x184   : > { %1258 = vperm.xlu1 %1863, %v208_v60   ;;  %1263 = vperm.xlu0 %1862, %v209_v17  }
 0x188   : > { %1268 = vperm.xlu1 %1863, %v210_v48   ;;  %1273 = vperm.xlu0 %1862, %v211_v22  }
 0x18a   : > { %v1893_v5 = vpop.eup %1892 }
 0x18b   : > { %v1895_v32 = vpop.eup %1894  ;;  %v1184_v0 = vxor.u32 2147483648, %v1893_v5 }
 0x18c   : > { %v1181_v42 = vxor.u32 2147483648, %v1895_v32 }
 0x18d   : > { %v1185_v35 = vsel %vm1183_vm6, %v1184_v0, %v1895_v32 }
 0x18e   : > { %v1182_v46 = vsel %vm1180_vm3, %v1893_v5, %v1181_v42 }
 0x18f   : > { %v1186_v57 = vsel %vm1179_vm7, %v1182_v46, %v1185_v35 }
 0x190   : > { %v1187_v23 = vsel %vm1176_vm10, nan, %v1186_v57 }
 0x191   : > { %v1721_v59 = vpack.c.bf16 %v1187_v23, %v1083_v43 }
 0x193   : > { %1722 = vmatprep.subr.bf16.mxu0 %v1721_v59  ;;  %1728 = vmatprep.subr.bf16.mxu1 %v1721_v59 }
 0x194   : > { %1724 = vmatpush3.bf16.msra.mxu0 %v1721_v59  ;;  %1732 = vmatpush3.bf16.msra.mxu1 %v1721_v59 }
 0x197   : > { %1686 = vmatmul.mubr.msk.f32.vlgmr.msra.gmra.mrb[0].mxu0 %vm1276_vm12, %v1189_v63  ;;  %1698 = vmatmul.mubr.msk.f32.vlgmr.msra.gmra.mrb[0].mxu1 %vm1276_vm12, %v1197_v37 }
 0x198   : > { %1688 = vmatprep.mubr.msk.f32.mxu0 %vm1276_vm12, %v1190_v4  ;;  %1700 = vmatprep.mubr.msk.f32.mxu1 %vm1276_vm12, %v1198_v29 }
 0x19b   : > { %1689 = vmatmul.mubr.msk.f32.gmra.mrb[2].mxu0 %vm1276_vm12, %v1191_v18  ;;  %1701 = vmatmul.mubr.msk.f32.gmra.mrb[2].mxu1 %vm1276_vm12, %v1199_v38 }
 0x19c   : > { %1691 = vmatprep.mubr.msk.f32.mxu0 %vm1276_vm12, %v1192_v61  ;;  %1703 = vmatprep.mubr.msk.f32.mxu1 %vm1276_vm12, %v1200_v20 }
 0x19f   : > { %1692 = vmatmul.mubr.msk.f32.gmra.mrb[4].mxu0 %vm1276_vm12, %v1193_v12  ;;  %1704 = vmatmul.mubr.msk.f32.gmra.mrb[4].mxu1 %vm1276_vm12, %v1201_v14 }
 0x1a0   : > { %1694 = vmatprep.mubr.msk.f32.mxu0 %vm1276_vm12, %v1194_v26  ;;  %1706 = vmatprep.mubr.msk.f32.mxu1 %vm1276_vm12, %v1202_v58 }
 0x1a3   : > { %1695 = vmatmul.mubr.msk.f32.gmra.mrb[6].mxu0 %vm1276_vm12, %v1195_v52  ;;  %1707 = vmatmul.mubr.msk.f32.gmra.mrb[6].mxu1 %vm1276_vm12, %v1203_v50 }
 0x1eb   : > { %v1210_v27 = vpop.permute.xlu1 %1209  ;;  %v1206_v3 = vpop.permute.xlu0 %1205 }
 0x1ef   : > { %v1214_v7 = vpop.permute.xlu1 %1213  ;;  %v1218_v13 = vpop.permute.xlu0 %1217 }
 0x1f3   : > { %v1222_v11 = vpop.permute.xlu1 %1221  ;;  %v1226_v28 = vpop.permute.xlu0 %1225 }
 0x1f7   : > { %v1230_v56 = vpop.permute.xlu1 %1229  ;;  %v1234_v39 = vpop.permute.xlu0 %1233 }
 0x1fb   : > { %v1239_v19 = vpop.permute.xlu1 %1238  ;;  %v1244_v40 = vpop.permute.xlu0 %1243 }
 0x1ff   : > { %v1249_v49 = vpop.permute.xlu1 %1248  ;;  %v1254_v2 = vpop.permute.xlu0 %1253 }
 0x203   : > { %v1259_v31 = vpop.permute.xlu1 %1258  ;;  %v1264_v45 = vpop.permute.xlu0 %1263 }
 0x207   : > { %v1269_v48 = vpop.permute.xlu1 %1268  ;;  %v1274_v22 = vpop.permute.xlu0 %1273 }
 0x26a   : > { %v1687_v41 = vpop.f32.mrb[0].mxu0  ;;  %v1699_v54 = vpop.f32.mrb[0].mxu1 }
 0x26b   : > { %v1397_v25 = vadd.f32 %v1687_v41, %v1210_v27  ;;  %v1437_v51 = vadd.f32 %v1699_v54, %v1244_v40  ;;  %v1391_v6 = vpop.f32.mrb[1].mxu0  ;;  %v1431_v8 = vpop.f32.mrb[1].mxu1 }
 0x26c   : > { %v1392_v9 = vadd.f32 %v1391_v6, %v1206_v3  ;;  %v1432_v33 = vadd.f32 %v1431_v8, %v1239_v19 }
 0x26d   : > { %1471 = vst [vmem:[%s2998_s10 + $0x8] sm:$0xff] %v1397_v25  ;;  %1479 = vst [vmem:[%s2998_s10 + $0x48] sm:$0xff] %v1437_v51 }
 0x26e   : > { %1470 = vst [vmem:[%s2998_s10] sm:$0xff] %v1392_v9  ;;  %1478 = vst [vmem:[%s2998_s10 + $0x40] sm:$0xff] %v1432_v33  ;;  %v1690_v15 = vpop.f32.mrb[2].mxu0  ;;  %v1702_v44 = vpop.f32.mrb[2].mxu1 }
 0x26f   : > { %v1407_v10 = vadd.f32 %v1690_v15, %v1218_v13  ;;  %v1447_v55 = vadd.f32 %v1702_v44, %v1254_v2  ;;  %v1401_v34 = vpop.f32.mrb[3].mxu0  ;;  %v1441_v24 = vpop.f32.mrb[3].mxu1 }
 0x270   : > { %v1402_v53 = vadd.f32 %v1401_v34, %v1214_v7  ;;  %v1442_v16 = vadd.f32 %v1441_v24, %v1249_v49 }
 0x271   : > { %1473 = vst [vmem:[%s2998_s10 + $0x18] sm:$0xff] %v1407_v10  ;;  %1481 = vst [vmem:[%s2998_s10 + $0x58] sm:$0xff] %v1447_v55 }
 0x272   : > { %1472 = vst [vmem:[%s2998_s10 + $0x10] sm:$0xff] %v1402_v53  ;;  %1480 = vst [vmem:[%s2998_s10 + $0x50] sm:$0xff] %v1442_v16  ;;  %v1693_v47 = vpop.f32.mrb[4].mxu0  ;;  %v1705_v30 = vpop.f32.mrb[4].mxu1 }
 0x273   : > { %v1417_v60 = vadd.f32 %v1693_v47, %v1226_v28  ;;  %v1457_v17 = vadd.f32 %v1705_v30, %v1264_v45  ;;  %v1411_v36 = vpop.f32.mrb[5].mxu0  ;;  %v1451_v5 = vpop.f32.mrb[5].mxu1 }
 0x274   : > { %v1412_v1 = vadd.f32 %v1411_v36, %v1222_v11  ;;  %v1452_v62 = vadd.f32 %v1451_v5, %v1259_v31 }
 0x275   : > { %1475 = vst [vmem:[%s2998_s10 + $0x28] sm:$0xff] %v1417_v60  ;;  %1483 = vst [vmem:[%s2998_s10 + $0x68] sm:$0xff] %v1457_v17 }
 0x276   : > { %1474 = vst [vmem:[%s2998_s10 + $0x20] sm:$0xff] %v1412_v1  ;;  %1482 = vst [vmem:[%s2998_s10 + $0x60] sm:$0xff] %v1452_v62  ;;  %v1696_v32 = vpop.f32.mrb[6].mxu0  ;;  %v1708_v0 = vpop.f32.mrb[6].mxu1 }
 0x277   : > { %v1427_v42 = vadd.f32 %v1696_v32, %v1234_v39  ;;  %v1467_v21 = vadd.f32 %v1708_v0, %v1274_v22  ;;  %v1421_v35 = vpop.f32.mrb[7].mxu0  ;;  %v1461_v46 = vpop.f32.mrb[7].mxu1 }
 0x278   : > { %v1422_v57 = vadd.f32 %v1421_v35, %v1230_v56  ;;  %v1462_v43 = vadd.f32 %v1461_v46, %v1269_v48 }
 0x279   : > { %1477 = vst [vmem:[%s2998_s10 + $0x38] sm:$0xff] %v1427_v42  ;;  %1485 = vst [vmem:[%s2998_s10 + $0x78] sm:$0xff] %v1467_v21 }
 0x27a   : > { %1476 = vst [vmem:[%s2998_s10 + $0x30] sm:$0xff] %v1422_v57  ;;  %1484 = vst [vmem:[%s2998_s10 + $0x70] sm:$0xff] %v1462_v43 }
 0x27b   : > { %1917 = shalt.err (!%p1914_p7)
}
 0x27c   : > { %s1918_s7 = scalar_lea.hbm %s3020_s27, 2048  ;;  %s1922_s10 = scalar_lea.hbm %s3083_s3, 8192 }
 0x27d   : > { %p1919_p9 = scmp.ne.s32.totalorder %s3020_s27, %s1918_s7  ;;  %p1923_p12 = scmp.lt.u32.totalorder %s3020_s27, %s3083_s3 }
 0x27e   : > { %p1924_p13 = scmp.lt.u32.totalorder %s1922_s10, %s1918_s7  ;;  %p1926_p1 = scmp.lt.u32.totalorder %s1918_s7, %s3020_s27 }
 0x27f   : > { %p1920_p10 = pnand %p1919_p9, %p2085_p3 }
 0x280   : > { %p1925_p0 = por %p1924_p13, %p1923_p12 }
 0x281   : > { %p1921_p11 = pneg %p1920_p10 }
 0x282   : > { %p1927_p2 = por %p1926_p1, %p1925_p0 }
 0x284   : > { %p1928_p4 = pnand %p1927_p2, %p1921_p11 }
 0x286   : > { %1931 = shalt.err (!%p1928_p4)
}
 0x287   : > { %s2011_s21 = smov 128   ;;  %s2012_s15 = smov 256  }
 0x288   : > { %s2013_s24 = smov 8  }
 0x289   : > { %1765 = dma.vmem_to_hbm [thread:$0]  (%p2085_p3), %s3015_s16, 2048, %s3020_s27, %s3028_s28, %s2011_s21, %s2012_s15, %s2013_s24  }
 0x28a PF: > { %p1771_p5 = scmp.ge.s32.totalorder %s1998_s19, 2  ;;  %s1516_s29 = sand.u32 1, %s1970_s12  }
 0x28b   : > { %s1517_s4 = scalar_lea.sflag [#allocation3], %s1516_s29 }
 0x28c   : > { %p1768_p6 = pnand %p1771_p5, %p2094_p8 }
 0x28e   : > { %1965 = dma.done.wait (!%p1768_p6), %s1517_s4, 2048  }
 0x28f   : > { %1967 = vsyncadd (!%p1768_p6), %s1517_s4, 4294965248  ;;  %s16_s19 = sadd.s32 1, %s1998_s19   ;;  %s3102_s12 = smov %s1974_s13 }
 0x290   : > { %p13_p7 = scmp.ge.s32.totalorder %s16_s19, 6   ;;  %s3103_s13 = smov %s1978_s14 }
 0x291   : > { %s3104_s14 = smov %s2103_s30  ;;  %s3105_s15 = smov %s1990_s17 }
 0x292   : > { %s3106_s16 = smov %s1994_s18  ;;  %s3107_s17 = smov %s3110_s22 }
 0x293   : > { %s3108_s18 = smov %s3114_s23  ;;  %15 = sbr.rel (!%p13_p7) target bundleno = 5 (0x5), region = 67 }
 0x29a   :  { %1522 = vsyncpa [#allocation3], 1 }
 0x29b   :  { %1524 = vsyncpa [#allocation3 + $0x1], 1 }

</bundles_post_ra>
